<compile_context>
chip_gen: v7x
topology: tpu7x:2x2x1
jax: 0.10.0
libtpu: 0.0.40
codegen_flags: <defaults>
</compile_context>

<pallas_src>
import functools

import jax
import jax.numpy as jnp
from jax.experimental import pallas as pl
from jax.experimental.pallas import tpu as pltpu


def _patch_nce_kernel(real_ref, fake_ref, loss_ref, m_sc, s_sc, pos_sc, *, tau):
    # real_ref: (TM, D) tile of query patches       (constant across j)
    # fake_ref: (CT, D) tile of key patches
    # loss_ref: (1, TM) lane-dense per-patch loss   (written at last j)
    # m_sc / s_sc / pos_sc: (1, TM) running max / running sumexp / pos logit
    i = pl.program_id(0)            # row (query) tile index
    j = pl.program_id(1)            # column (key) tile index
    n_col = pl.num_programs(1)
    tm = real_ref.shape[0]
    ct = fake_ref.shape[0]

    inv_tau = jnp.float32(1.0 / tau)
    neg_fill = jnp.float32(-10.0 / tau)      # diag fill, already divided by tau

    @pl.when(j == 0)
    def _init():
        m_sc[...] = jnp.full_like(m_sc, -jnp.inf)
        s_sc[...] = jnp.zeros_like(s_sc)
        pos_sc[...] = jnp.zeros_like(pos_sc)

    # Fold 1/tau into the small real tile; keep the dot in the input dtype with
    # an f32 accumulate (bf16 inputs would hit the MXU natively).
    fake = fake_ref[...]
    real_scaled = (real_ref[...].astype(jnp.float32) * inv_tau).astype(fake.dtype)

    # s[c, r] = (fake[col_start + c] . real[row_start + r]) / tau   -> (CT, TM)
    s = jax.lax.dot_general(
        fake, real_scaled, (((1,), (1,)), ((), ())),
        preferred_element_type=jnp.float32)

    def online_lse_update(s_blk):
        m_prev = m_sc[...]
        m_new = jnp.maximum(m_prev, jnp.max(s_blk, axis=0, keepdims=True))
        s_sc[...] = (s_sc[...] * jnp.exp(m_prev - m_new)
                     + jnp.sum(jnp.exp(s_blk - m_new), axis=0, keepdims=True))
        m_sc[...] = m_new

    row_start = i * tm
    col_start = j * ct
    has_diag = jnp.logical_and(col_start < row_start + tm,
                               row_start < col_start + ct)

    @pl.when(has_diag)
    def _with_diag():
        key_ids = col_start + jax.lax.broadcasted_iota(jnp.int32, (ct, tm), 0)
        qry_ids = row_start + jax.lax.broadcasted_iota(jnp.int32, (ct, tm), 1)
        diag = key_ids == qry_ids
        # positive logit real[r] . fake[r] / tau, extracted from the diagonal.
        pos_sc[...] += jnp.sum(jnp.where(diag, s, 0.0), axis=0, keepdims=True)
        online_lse_update(jnp.where(diag, neg_fill, s))

    @pl.when(jnp.logical_not(has_diag))
    def _without_diag():
        online_lse_update(s)

    @pl.when(j == n_col - 1)
    def _finalize():
        pos = pos_sc[...]
        m_fin = jnp.maximum(m_sc[...], pos)
        sumexp = s_sc[...] * jnp.exp(m_sc[...] - m_fin) + jnp.exp(pos - m_fin)
        loss_ref[...] = m_fin + jnp.log(sumexp) - pos


def patch_nce_loss(real_feats, fake_feats, *, tau, bs=1, tile_m=128, col_tile=256):
    """Pallas implementation of PatchNCELoss.forward.

    real_feats, fake_feats: (N, D) arrays (patches x feature dim).
    Returns per-patch loss of shape (N,), float32.
    """
    # TODO(synk): the original module only works for bs == 1 (torch.cat would
    # fail otherwise); general bs reshaping is therefore not implemented.
    assert bs == 1, "PatchNCELoss is only well-defined for bs == 1"
    n, d = real_feats.shape
    assert fake_feats.shape == (n, d)
    tile_m = min(tile_m, n)
    col_tile = min(col_tile, n)
    # TODO(synk): ragged N (not a multiple of the tiles) would need pl.cdiv +
    # masking of out-of-range rows/cols; not needed for the shapes used here.
    assert n % tile_m == 0 and n % col_tile == 0

    # fake_feats is "detached" in torch; that's a no-op for a forward-only kernel.
    kernel = functools.partial(_patch_nce_kernel, tau=float(tau))

    loss = pl.pallas_call(
        kernel,
        out_shape=jax.ShapeDtypeStruct((1, n), jnp.float32),
        grid_spec=pltpu.PrefetchScalarGridSpec(
            num_scalar_prefetch=0,
            grid=(n // tile_m, n // col_tile),
            in_specs=[
                pl.BlockSpec((tile_m, d), lambda i, j: (i, 0)),    # real tile
                pl.BlockSpec((col_tile, d), lambda i, j: (j, 0)),  # fake tile
            ],
            out_specs=pl.BlockSpec((1, tile_m), lambda i, j: (0, i)),
            scratch_shapes=[
                pltpu.VMEM((1, tile_m), jnp.float32),   # running max
                pltpu.VMEM((1, tile_m), jnp.float32),   # running sumexp
                pltpu.VMEM((1, tile_m), jnp.float32),   # positive logit
            ],
        ),
        compiler_params=pltpu.CompilerParams(
            dimension_semantics=("parallel", "arbitrary")),
    )(real_feats, fake_feats)
    return loss.reshape(n)


def _reference_loss(real, fake, tau):
    n = real.shape[0]
    real = real.astype(jnp.float32)
    fake = fake.astype(jnp.float32)
    l_pos = jnp.sum(real * fake, axis=-1, keepdims=True)
    s = real @ fake.T
    s = jnp.where(jnp.eye(n, dtype=bool), -10.0, s)
    out = jnp.concatenate([l_pos, s], axis=1) / tau
    lse = jax.scipy.special.logsumexp(out, axis=1)
    return lse - out[:, 0]


if __name__ == "__main__":
    # Small deterministic example: bs=1, 256 patches, 32-dim features.
    N, D = 256, 32
    tau = 0.07
    key = jax.random.PRNGKey(0)
    k1, k2 = jax.random.split(key)
    real_feats = jax.random.normal(k1, (N, D), dtype=jnp.float32)
    fake_feats = jax.random.normal(k2, (N, D), dtype=jnp.float32)

    loss = patch_nce_loss(real_feats, fake_feats, tau=tau, bs=1,
                          tile_m=128, col_tile=256)
    loss = jax.block_until_ready(loss)

    ref = _reference_loss(real_feats, fake_feats, tau)
    assert loss.shape == (N,)
    assert jnp.allclose(loss, ref, atol=1e-3, rtol=1e-3), (
        float(jnp.max(jnp.abs(loss - ref))))
    print("KERNEL_OK")
</pallas_src>

<mosaic_0001>
module attributes {stable_mosaic.version = 11 : i64} {
  func.func @_patch_nce_kernel(%arg0: i32, %arg1: i32, %arg2: memref<128x32xf32, #tpu.memory_space<vmem>>, %arg3: memref<256x32xf32, #tpu.memory_space<vmem>>, %arg4: memref<1x128xf32, #tpu.memory_space<vmem>>, %arg5: memref<1x128xf32, #tpu.memory_space<vmem>>, %arg6: memref<1x128xf32, #tpu.memory_space<vmem>>, %arg7: memref<1x128xf32, #tpu.memory_space<vmem>>) attributes {dimension_semantics = [#tpu.dimension_semantics<parallel>, #tpu.dimension_semantics<arbitrary>], iteration_bounds = array<i64: 2, 1>, scalar_prefetch = 0 : i64, scratch_operands = 3 : i64, tpu.core_type = #tpu.core_type<tc>, window_params = [{transform_indices = @transform_0, window_bounds = array<i64: 128, 32>}, {transform_indices = @transform_1, window_bounds = array<i64: 256, 32>}, {transform_indices = @transform_2, window_bounds = array<i64: 1, 128>}]} {
    %c0_i32 = arith.constant 0 : i32
    %0 = arith.cmpi eq, %arg1, %c0_i32 : i32
    %1 = arith.extui %0 : i1 to i32
    %c0_i32_0 = arith.constant 0 : i32
    %2 = arith.cmpi ne, %1, %c0_i32_0 : i32
    scf.if %2 {
      %cst_12 = arith.constant 0xFF800000 : f32
      %23 = vector.broadcast %cst_12 : f32 to vector<1x128xf32>
      %c0_13 = arith.constant 0 : index
      %c0_14 = arith.constant 0 : index
      %24 = vector.load %arg5[%c0_13, %c0_14] : memref<1x128xf32, #tpu.memory_space<vmem>>, vector<1x128xf32>
      tpu.vector_store %arg5[%c0_13, %c0_14], %23 {strides = array<i32>} : memref<1x128xf32, #tpu.memory_space<vmem>>, vector<1x128xf32>,
      %cst_15 = arith.constant 0.000000e+00 : f32
      %25 = vector.broadcast %cst_15 : f32 to vector<1x128xf32>
      %c0_16 = arith.constant 0 : index
      %c0_17 = arith.constant 0 : index
      %26 = vector.load %arg6[%c0_16, %c0_17] : memref<1x128xf32, #tpu.memory_space<vmem>>, vector<1x128xf32>
      tpu.vector_store %arg6[%c0_16, %c0_17], %25 {strides = array<i32>} : memref<1x128xf32, #tpu.memory_space<vmem>>, vector<1x128xf32>,
      %cst_18 = arith.constant 0.000000e+00 : f32
      %27 = vector.broadcast %cst_18 : f32 to vector<1x128xf32>
      %c0_19 = arith.constant 0 : index
      %c0_20 = arith.constant 0 : index
      %28 = vector.load %arg7[%c0_19, %c0_20] : memref<1x128xf32, #tpu.memory_space<vmem>>, vector<1x128xf32>
      tpu.vector_store %arg7[%c0_19, %c0_20], %27 {strides = array<i32>} : memref<1x128xf32, #tpu.memory_space<vmem>>, vector<1x128xf32>,
    } else {
    }
    %c0 = arith.constant 0 : index
    %c0_1 = arith.constant 0 : index
    %3 = vector.load %arg3[%c0, %c0_1] : memref<256x32xf32, #tpu.memory_space<vmem>>, vector<256x32xf32>
    %c0_2 = arith.constant 0 : index
    %c0_3 = arith.constant 0 : index
    %4 = vector.load %arg2[%c0_2, %c0_3] : memref<128x32xf32, #tpu.memory_space<vmem>>, vector<128x32xf32>
    %cst = arith.constant 14.2857141 : f32
    %5 = vector.broadcast %cst : f32 to vector<128x32xf32>
    %6 = arith.mulf %4, %5 : vector<128x32xf32>
    %cst_4 = arith.constant dense<0.000000e+00> : vector<256x128xf32>
    %7 = tpu.matmul %3, %6, %cst_4 {dimension_numbers = #tpu.dot_dimension_numbers<[1], [1], [0], [0], [0, 0, 1, 0], [], []>} : vector<256x32xf32>, vector<128x32xf32>, vector<256x128xf32> -> vector<256x128xf32>
    %c128_i32 = arith.constant 128 : i32
    %8 = arith.muli %arg0, %c128_i32 : i32
    %c256_i32 = arith.constant 256 : i32
    %9 = arith.muli %arg1, %c256_i32 : i32
    %c128_i32_5 = arith.constant 128 : i32
    %10 = arith.addi %8, %c128_i32_5 : i32
    %11 = arith.cmpi slt, %9, %10 : i32
    %c256_i32_6 = arith.constant 256 : i32
    %12 = arith.addi %9, %c256_i32_6 : i32
    %13 = arith.cmpi slt, %8, %12 : i32
    %14 = arith.andi %11, %13 : i1
    %15 = arith.extui %14 : i1 to i32
    %cst_7 = arith.constant -142.857147 : f32
    %c0_i32_8 = arith.constant 0 : i32
    %16 = arith.cmpi ne, %15, %c0_i32_8 : i32
    scf.if %16 {
      %23 = tpu.iota {dimensions = array<i32: 0>} : vector<256x128xi32>
      %24 = vector.broadcast %9 : i32 to vector<256x128xi32>
      %25 = arith.addi %24, %23 : vector<256x128xi32>
      %26 = tpu.iota {dimensions = array<i32: 1>} : vector<256x128xi32>
      %27 = vector.broadcast %8 : i32 to vector<256x128xi32>
      %28 = arith.addi %27, %26 : vector<256x128xi32>
      %29 = arith.cmpi eq, %25, %28 : vector<256x128xi32>
      %c0_12 = arith.constant 0 : index
      %c0_13 = arith.constant 0 : index
      %30 = vector.load %arg7[%c0_12, %c0_13] : memref<1x128xf32, #tpu.memory_space<vmem>>, vector<1x128xf32>
      %cst_14 = arith.constant 0.000000e+00 : f32
      %31 = vector.broadcast %cst_14 : f32 to vector<256x128xf32>
      %32 = arith.select %29, %7, %31 : vector<256x128xi1>, vector<256x128xf32>
      %cst_15 = arith.constant dense<0.000000e+00> : vector<128xf32>
      %33 = vector.multi_reduction <add>, %32, %cst_15 [0] : vector<256x128xf32> to vector<128xf32>
      %34 = vector.shape_cast %33 : vector<128xf32> to vector<1x128xf32>
      %35 = arith.addf %30, %34 : vector<1x128xf32>
      %c0_16 = arith.constant 0 : index
      %c0_17 = arith.constant 0 : index
      %36 = vector.load %arg7[%c0_16, %c0_17] : memref<1x128xf32, #tpu.memory_space<vmem>>, vector<1x128xf32>
      tpu.vector_store %arg7[%c0_16, %c0_17], %35 {strides = array<i32>} : memref<1x128xf32, #tpu.memory_space<vmem>>, vector<1x128xf32>,
      %37 = vector.broadcast %cst_7 : f32 to vector<256x128xf32>
      %38 = arith.select %29, %37, %7 : vector<256x128xi1>, vector<256x128xf32>
      %c0_18 = arith.constant 0 : index
      %c0_19 = arith.constant 0 : index
      %39 = vector.load %arg5[%c0_18, %c0_19] : memref<1x128xf32, #tpu.memory_space<vmem>>, vector<1x128xf32>
      %cst_20 = arith.constant dense<0xFF800000> : vector<128xf32>
      %40 = vector.multi_reduction <maximumf>, %38, %cst_20 [0] : vector<256x128xf32> to vector<128xf32>
      %41 = vector.shape_cast %40 : vector<128xf32> to vector<1x128xf32>
      %42 = arith.maximumf %39, %41 : vector<1x128xf32>
      %c0_21 = arith.constant 0 : index
      %c0_22 = arith.constant 0 : index
      %43 = vector.load %arg6[%c0_21, %c0_22] : memref<1x128xf32, #tpu.memory_space<vmem>>, vector<1x128xf32>
      %44 = arith.subf %39, %42 : vector<1x128xf32>
      %45 = math.exp %44 : vector<1x128xf32>
      %46 = arith.mulf %43, %45 : vector<1x128xf32>
      %47 = vector.broadcast %42 : vector<1x128xf32> to vector<256x128xf32>
      %48 = arith.subf %38, %47 : vector<256x128xf32>
      %49 = math.exp %48 : vector<256x128xf32>
      %cst_23 = arith.constant dense<0.000000e+00> : vector<128xf32>
      %50 = vector.multi_reduction <add>, %49, %cst_23 [0] : vector<256x128xf32> to vector<128xf32>
      %51 = vector.shape_cast %50 : vector<128xf32> to vector<1x128xf32>
      %52 = arith.addf %46, %51 : vector<1x128xf32>
      %c0_24 = arith.constant 0 : index
      %c0_25 = arith.constant 0 : index
      %53 = vector.load %arg6[%c0_24, %c0_25] : memref<1x128xf32, #tpu.memory_space<vmem>>, vector<1x128xf32>
      tpu.vector_store %arg6[%c0_24, %c0_25], %52 {strides = array<i32>} : memref<1x128xf32, #tpu.memory_space<vmem>>, vector<1x128xf32>,
      %c0_26 = arith.constant 0 : index
      %c0_27 = arith.constant 0 : index
      %54 = vector.load %arg5[%c0_26, %c0_27] : memref<1x128xf32, #tpu.memory_space<vmem>>, vector<1x128xf32>
      tpu.vector_store %arg5[%c0_26, %c0_27], %42 {strides = array<i32>} : memref<1x128xf32, #tpu.memory_space<vmem>>, vector<1x128xf32>,
    } else {
    }
    %true = arith.constant true
    %17 = arith.xori %14, %true : i1
    %18 = arith.extui %17 : i1 to i32
    %c0_i32_9 = arith.constant 0 : i32
    %19 = arith.cmpi ne, %18, %c0_i32_9 : i32
    scf.if %19 {
      %c0_12 = arith.constant 0 : index
      %c0_13 = arith.constant 0 : index
      %23 = vector.load %arg5[%c0_12, %c0_13] : memref<1x128xf32, #tpu.memory_space<vmem>>, vector<1x128xf32>
      %cst_14 = arith.constant dense<0xFF800000> : vector<128xf32>
      %24 = vector.multi_reduction <maximumf>, %7, %cst_14 [0] : vector<256x128xf32> to vector<128xf32>
      %25 = vector.shape_cast %24 : vector<128xf32> to vector<1x128xf32>
      %26 = arith.maximumf %23, %25 : vector<1x128xf32>
      %c0_15 = arith.constant 0 : index
      %c0_16 = arith.constant 0 : index
      %27 = vector.load %arg6[%c0_15, %c0_16] : memref<1x128xf32, #tpu.memory_space<vmem>>, vector<1x128xf32>
      %28 = arith.subf %23, %26 : vector<1x128xf32>
      %29 = math.exp %28 : vector<1x128xf32>
      %30 = arith.mulf %27, %29 : vector<1x128xf32>
      %31 = vector.broadcast %26 : vector<1x128xf32> to vector<256x128xf32>
      %32 = arith.subf %7, %31 : vector<256x128xf32>
      %33 = math.exp %32 : vector<256x128xf32>
      %cst_17 = arith.constant dense<0.000000e+00> : vector<128xf32>
      %34 = vector.multi_reduction <add>, %33, %cst_17 [0] : vector<256x128xf32> to vector<128xf32>
      %35 = vector.shape_cast %34 : vector<128xf32> to vector<1x128xf32>
      %36 = arith.addf %30, %35 : vector<1x128xf32>
      %c0_18 = arith.constant 0 : index
      %c0_19 = arith.constant 0 : index
      %37 = vector.load %arg6[%c0_18, %c0_19] : memref<1x128xf32, #tpu.memory_space<vmem>>, vector<1x128xf32>
      tpu.vector_store %arg6[%c0_18, %c0_19], %36 {strides = array<i32>} : memref<1x128xf32, #tpu.memory_space<vmem>>, vector<1x128xf32>,
      %c0_20 = arith.constant 0 : index
      %c0_21 = arith.constant 0 : index
      %38 = vector.load %arg5[%c0_20, %c0_21] : memref<1x128xf32, #tpu.memory_space<vmem>>, vector<1x128xf32>
      tpu.vector_store %arg5[%c0_20, %c0_21], %26 {strides = array<i32>} : memref<1x128xf32, #tpu.memory_space<vmem>>, vector<1x128xf32>,
    } else {
    }
    %c0_i32_10 = arith.constant 0 : i32
    %20 = arith.cmpi eq, %arg1, %c0_i32_10 : i32
    %21 = arith.extui %20 : i1 to i32
    %c0_i32_11 = arith.constant 0 : i32
    %22 = arith.cmpi ne, %21, %c0_i32_11 : i32
    scf.if %22 {
      %c0_12 = arith.constant 0 : index
      %c0_13 = arith.constant 0 : index
      %23 = vector.load %arg7[%c0_12, %c0_13] : memref<1x128xf32, #tpu.memory_space<vmem>>, vector<1x128xf32>
      %c0_14 = arith.constant 0 : index
      %c0_15 = arith.constant 0 : index
      %24 = vector.load %arg5[%c0_14, %c0_15] : memref<1x128xf32, #tpu.memory_space<vmem>>, vector<1x128xf32>
      %25 = arith.maximumf %24, %23 : vector<1x128xf32>
      %c0_16 = arith.constant 0 : index
      %c0_17 = arith.constant 0 : index
      %26 = vector.load %arg6[%c0_16, %c0_17] : memref<1x128xf32, #tpu.memory_space<vmem>>, vector<1x128xf32>
      %c0_18 = arith.constant 0 : index
      %c0_19 = arith.constant 0 : index
      %27 = vector.load %arg5[%c0_18, %c0_19] : memref<1x128xf32, #tpu.memory_space<vmem>>, vector<1x128xf32>
      %28 = arith.subf %27, %25 : vector<1x128xf32>
      %29 = math.exp %28 : vector<1x128xf32>
      %30 = arith.mulf %26, %29 : vector<1x128xf32>
      %31 = arith.subf %23, %25 : vector<1x128xf32>
      %32 = math.exp %31 : vector<1x128xf32>
      %33 = arith.addf %30, %32 : vector<1x128xf32>
      %34 = math.log %33 : vector<1x128xf32>
      %35 = arith.addf %25, %34 : vector<1x128xf32>
      %36 = arith.subf %35, %23 : vector<1x128xf32>
      %c0_20 = arith.constant 0 : index
      %c0_21 = arith.constant 0 : index
      %37 = vector.load %arg4[%c0_20, %c0_21] : memref<1x128xf32, #tpu.memory_space<vmem>>, vector<1x128xf32>
      tpu.vector_store %arg4[%c0_20, %c0_21], %36 {strides = array<i32>} : memref<1x128xf32, #tpu.memory_space<vmem>>, vector<1x128xf32>,
    } else {
    }
    return
  }
  func.func @transform_0(%arg0: i32, %arg1: i32) -> (i32, i32) {
    %c0_i32 = arith.constant 0 : i32
    %c0_i32_0 = arith.constant 0 : i32
    return %arg0, %c0_i32 : i32, i32
  }
  func.func @transform_1(%arg0: i32, %arg1: i32) -> (i32, i32) {
    %c0_i32 = arith.constant 0 : i32
    %c0_i32_0 = arith.constant 0 : i32
    return %arg1, %c0_i32 : i32, i32
  }
  func.func @transform_2(%arg0: i32, %arg1: i32) -> (i32, i32) {
    %c0_i32 = arith.constant 0 : i32
    %c0_i32_0 = arith.constant 0 : i32
    return %c0_i32, %arg0 : i32, i32
  }
}

</mosaic_0001>

<bundles_post_ra>
// kernel: tpu_custom_call.1
= control target key start
LH: loop header
LB: loop body
LE: loop exit
PB: predicated region body
PF: predicated region fallthrough
CT: control target
= control target key end

     0   :  { %7 = vsyncpa [#allocation6], 0  ;;  %s2985_s0 = inlined_call_operand.vmem [shape: f32[256,32], index: 0, kind: input, shape index: {}]   ;;  %s2986_s1 = inlined_call_operand.vmem [shape: f32[256,32], index: 1, kind: input, shape index: {}]   ;;  %s2987_s2 = inlined_call_operand.hbm [shape: f32[1,256], index: 2, kind: output, shape index: {}]  }
   0x1   :  { %9 = vsyncpa [#allocation6 + $0x1], 0  ;;  %s1866_s9 = smov 0   ;;  %s1868_s10 = smov 0  }
   0x2   :  { %s1870_s11 = smov 0   ;;  %s1872_s12 = smov 0  }
   0x3   :  { %s1874_s13 = smov 0   ;;  %s1876_s14 = smov 0  }
   0x4 LB: > { %s1320_s15 = sadd.s32 4294967295, %s1846_s14   ;;  %s1321_s16 = sadd.s32 4294967294, %s1846_s14   ;;  %s1846_s14 = sphi %s1876_s14, %s15_s14   ;;  %s1842_s13 = sphi %s1874_s13, %s3210_s13   ;;  %s1838_s12 = sphi %s1872_s12, %s3209_s12   ;;  %s1834_s11 = sphi %s1870_s11, %s3208_s11   ;;  %s1830_s10 = sphi %s1868_s10, %s3207_s10   ;;  %s1826_s9 = sphi %s1866_s9, %s3206_s9  }
   0x5   : > { %s27_s17 = sadd.s32 1, %s1842_s13  ;;  %s86_s18 = sadd.s32 1, %s1834_s11 }
   0x6   : > { %p29_p0 = scmp.ge.s32.totalorder %s27_s17, 2  ;;  %p96_p1 = scmp.ne.s32.totalorder %s1834_s11, %s1830_s10 }
   0x7   : > { %p97_p2 = scmp.eq.s32.totalorder %s1320_s15, 1  ;;  %p102_p3 = scmp.ne.s32.totalorder %s1830_s10, %s1826_s9 }
   0x8   : > { %s3212_s17 = smov (%p29_p0, %s27_s17), 0  ;;  %p103_p5 = scmp.eq.s32.totalorder %s1321_s16, 1 }
   0x9   : > { %p1906_p4 = por %p97_p2, %p96_p1  ;;  %s83_s20 = ssub.s32 %s1842_s13, %s3212_s17 }
   0xa   : > { %p1325_p6 = scmp.ge.s32.totalorder %s1846_s14, 1  ;;  %p84_p7 = scmp.eq.s32.totalorder %s83_s20, 0 }
   0xb   : > { %p1913_p8 = por %p103_p5, %p102_p3  ;;  %p139_p9 = scmp.lt.s32.totalorder %s1846_s14, 3 }
   0xc   : > { %s1919_s22 = scalar_select %p84_p7, %s1834_s11, %s86_s18  }
   0xd   : > { %p140_p10 = pnand %p1325_p6, %p139_p9 }
   0xf   : > { %143 = sbr.rel (%p140_p10) target bundleno = 680 (0x2a8), region = 28 }
  0x16   : > { %s163_s23 = sand.u32 1, %s1830_s10   ;;  %s1923_s24 = sshll.u32 %s1838_s12, 4  ;;  %vm248_vm0 = vcmask 261120   ;;  %v184_v0 = vld [vmem:[%s2986_s1] sm:$0xff]  ;;  %v1848_v1 = vmov -inf   ;;  %v1849_v2 = vmov 0.0  }
  0x17   : > { %p166_p11 = scmp.lt.s32.totalorder %s1923_s24, 31  ;;  %181 = vst [vmem:[#allocation2] sm:$0x1] %v1848_v1  ;;  %182 = vst [vmem:[#allocation3] sm:$0x1] %v1849_v2  ;;  %1461 = vmatprep.mubr.msk.f32.mxu0 %vm248_vm0, %v184_v0  ;;  %v200_v3 = vld [vmem:[%s2986_s1 + $0x80] sm:$0xff] }
  0x18   : > { %183 = vst [vmem:[#allocation4] sm:$0x1] %v1849_v2  ;;  %1485 = vmatprep.mubr.msk.f32.mxu1 %vm248_vm0, %v200_v3  ;;  %vm1946_vm1 = vmpackc.low %vm248_vm0, %vm248_vm0  ;;  %v185_v45 = vld [vmem:[%s2986_s1 + $0x8] sm:$0xff]  ;;  %v186_v47 = vld [vmem:[%s2986_s1 + $0x10] sm:$0xff] }
  0x19   : > { %s167_s29 = scalar_select %p166_p11, %s1923_s24, 31  ;;  %v201_v46 = vld [vmem:[%s2986_s1 + $0x88] sm:$0xff]  ;;  %v202_v48 = vld [vmem:[%s2986_s1 + $0x90] sm:$0xff]  ;;  %v187_v49 = vld [vmem:[%s2986_s1 + $0x18] sm:$0xff] }
  0x1a   : > { %v203_v50 = vld [vmem:[%s2986_s1 + $0x98] sm:$0xff]  ;;  %v188_v51 = vld [vmem:[%s2986_s1 + $0x20] sm:$0xff]  ;;  %v189_v53 = vld [vmem:[%s2986_s1 + $0x28] sm:$0xff] }
  0x1b   : > { %s1327_s30 = sshll.u32 %s167_s29, 3  ;;  %v204_v52 = vld [vmem:[%s2986_s1 + $0xa0] sm:$0xff]  ;;  %v205_v54 = vld [vmem:[%s2986_s1 + $0xa8] sm:$0xff]  ;;  %v190_v55 = vld [vmem:[%s2986_s1 + $0x30] sm:$0xff] }
  0x1c   : > { %s1938_s5 = scalar_lea.vmem %s2985_s0, %s1327_s30  ;;  %v206_v56 = vld [vmem:[%s2986_s1 + $0xb0] sm:$0xff]  ;;  %v191_v57 = vld [vmem:[%s2986_s1 + $0x38] sm:$0xff]  ;;  %v192_v59 = vld [vmem:[%s2986_s1 + $0x40] sm:$0xff]  ;;  %s2147_s30 = sshll.u32 %s1838_s12, 7 }
  0x1d   : > { %v216_v4 = vld [vmem:[%s1938_s5] sm:$0xff]  ;;  %v217_v5 = vld [vmem:[%s1938_s5 + $0x8] sm:$0xff]  ;;  %v218_v6 = vld [vmem:[%s1938_s5 + $0x10] sm:$0xff]  ;;  %s620_s3 = sadd.s32 128, %s2147_s30  ;;  %p623_p13 = scmp.lt.s32.totalorder %s2147_s30, 256 }
  0x1e   : > { %v232_v7 = vmul.f32 14.285714, %v216_v4  ;;  %v233_v8 = vmul.f32 14.285714, %v217_v5  ;;  %v219_v9 = vld [vmem:[%s1938_s5 + $0x18] sm:$0xff]  ;;  %v220_v15 = vld [vmem:[%s1938_s5 + $0x20] sm:$0xff] }
  0x1f   : > { %v234_v11 = vmul.f32 14.285714, %v218_v6  ;;  %v235_v12 = vmul.f32 14.285714, %v219_v9  ;;  %v221_v16 = vld [vmem:[%s1938_s5 + $0x28] sm:$0xff]  ;;  %v222_v20 = vld [vmem:[%s1938_s5 + $0x30] sm:$0xff] }
  0x20   : > { %v1509_v13 = vpack.c.bf16 %v233_v8, %v232_v7  ;;  %v236_v17 = vmul.f32 14.285714, %v220_v15  ;;  %v237_v18 = vmul.f32 14.285714, %v221_v16  ;;  %v223_v21 = vld [vmem:[%s1938_s5 + $0x38] sm:$0xff]  ;;  %v224_v25 = vld [vmem:[%s1938_s5 + $0x40] sm:$0xff] }
  0x21   : > { %v1515_v14 = vpack.c.bf16 %v235_v12, %v234_v11  ;;  %v238_v22 = vmul.f32 14.285714, %v222_v20  ;;  %v239_v23 = vmul.f32 14.285714, %v223_v21  ;;  %v225_v26 = vld [vmem:[%s1938_s5 + $0x48] sm:$0xff]  ;;  %v226_v30 = vld [vmem:[%s1938_s5 + $0x50] sm:$0xff] }
  0x22   : > { %1511 = vmatprep.subr.msk.bf16.mxu0 %vm1946_vm1, %v1509_v13  ;;  %1557 = vmatprep.subr.msk.bf16.mxu1 %vm1946_vm1, %v1509_v13  ;;  %v1521_v19 = vpack.c.bf16 %v237_v18, %v236_v17  ;;  %v240_v27 = vmul.f32 14.285714, %v224_v25  ;;  %v241_v28 = vmul.f32 14.285714, %v225_v26  ;;  %v227_v31 = vld [vmem:[%s1938_s5 + $0x58] sm:$0xff]  ;;  %v228_v35 = vld [vmem:[%s1938_s5 + $0x60] sm:$0xff] }
  0x23   : > { %1514 = vmatpush3.bf16.xpose.msk.msra.mxu0 %vm1946_vm1, %v1509_v13  ;;  %1565 = vmatpush3.bf16.xpose.msk.msra.mxu1 %vm1946_vm1, %v1509_v13  ;;  %v1527_v24 = vpack.c.bf16 %v239_v23, %v238_v22  ;;  %v242_v32 = vmul.f32 14.285714, %v226_v30  ;;  %v243_v33 = vmul.f32 14.285714, %v227_v31  ;;  %v229_v36 = vld [vmem:[%s1938_s5 + $0x68] sm:$0xff]  ;;  %v230_v40 = vld [vmem:[%s1938_s5 + $0x70] sm:$0xff] }
  0x24   : > { %1517 = vmatprep.subr.msk.bf16.mxu0 %vm1946_vm1, %v1515_v14  ;;  %1558 = vmatprep.subr.msk.bf16.mxu1 %vm1946_vm1, %v1515_v14  ;;  %v1533_v29 = vpack.c.bf16 %v241_v28, %v240_v27  ;;  %v244_v37 = vmul.f32 14.285714, %v228_v35  ;;  %v245_v38 = vmul.f32 14.285714, %v229_v36  ;;  %v231_v41 = vld [vmem:[%s1938_s5 + $0x78] sm:$0xff]  ;;  %v208_v60 = vld [vmem:[%s2986_s1 + $0xc0] sm:$0xff] }
  0x25   : > { %v1539_v34 = vpack.c.bf16 %v243_v33, %v242_v32  ;;  %v246_v42 = vmul.f32 14.285714, %v230_v40  ;;  %v247_v43 = vmul.f32 14.285714, %v231_v41  ;;  %v207_v58 = vld [vmem:[%s2986_s1 + $0xb8] sm:$0xff]  ;;  %v193_v61 = vld [vmem:[%s2986_s1 + $0x48] sm:$0xff] }
  0x26   : > { %v1545_v39 = vpack.c.bf16 %v245_v38, %v244_v37  ;;  %v209_v62 = vld [vmem:[%s2986_s1 + $0xc8] sm:$0xff]  ;;  %v194_v63 = vld [vmem:[%s2986_s1 + $0x50] sm:$0xff]  ;;  %v195_v1 = vld [vmem:[%s2986_s1 + $0x58] sm:$0xff]  ;;  %p1377_p12 = scmp.gt.s32.totalorder %s620_s3, 0  ;;  %s2221_s12 = scalar_lea.vmem [#allocation5], %s163_s23 }
  0x27   : > { %v1551_v44 = vpack.c.bf16 %v247_v43, %v246_v42  ;;  %v210_v0 = vld [vmem:[%s2986_s1 + $0xd0] sm:$0xff]  ;;  %v211_v2 = vld [vmem:[%s2986_s1 + $0xd8] sm:$0xff]  ;;  %v196_v3 = vld [vmem:[%s2986_s1 + $0x60] sm:$0xff] }
  0x28   : > { %v212_v4 = vld [vmem:[%s2986_s1 + $0xe0] sm:$0xff]  ;;  %v197_v5 = vld [vmem:[%s2986_s1 + $0x68] sm:$0xff]  ;;  %v198_v7 = vld [vmem:[%s2986_s1 + $0x70] sm:$0xff]  ;;  %p2151_p0 = pnand %p1377_p12, %p623_p13 }
  0x29   : > { %v213_v6 = vld [vmem:[%s2986_s1 + $0xe8] sm:$0xff]  ;;  %v214_v8 = vld [vmem:[%s2986_s1 + $0xf0] sm:$0xff]  ;;  %v199_v9 = vld [vmem:[%s2986_s1 + $0x78] sm:$0xff] }
  0x2a   : > { %v215_v10 = vld [vmem:[%s2986_s1 + $0xf8] sm:$0xff] }
  0x2b   : > { %1520 = vmatpush3.bf16.xpose.msk.msra.mxu0 %vm1946_vm1, %v1515_v14  ;;  %1566 = vmatpush3.bf16.xpose.msk.msra.mxu1 %vm1946_vm1, %v1515_v14 }
  0x2c   : > { %1523 = vmatprep.subr.msk.bf16.mxu0 %vm1946_vm1, %v1521_v19  ;;  %1559 = vmatprep.subr.msk.bf16.mxu1 %vm1946_vm1, %v1521_v19 }
  0x33   : > { %1526 = vmatpush3.bf16.xpose.msk.msra.mxu0 %vm1946_vm1, %v1521_v19  ;;  %1567 = vmatpush3.bf16.xpose.msk.msra.mxu1 %vm1946_vm1, %v1521_v19 }
  0x34   : > { %1529 = vmatprep.subr.msk.bf16.mxu0 %vm1946_vm1, %v1527_v24  ;;  %1560 = vmatprep.subr.msk.bf16.mxu1 %vm1946_vm1, %v1527_v24 }
  0x3b   : > { %1532 = vmatpush3.bf16.xpose.msk.msra.mxu0 %vm1946_vm1, %v1527_v24  ;;  %1568 = vmatpush3.bf16.xpose.msk.msra.mxu1 %vm1946_vm1, %v1527_v24 }
  0x3c   : > { %1535 = vmatprep.subr.msk.bf16.mxu0 %vm1946_vm1, %v1533_v29  ;;  %1561 = vmatprep.subr.msk.bf16.mxu1 %vm1946_vm1, %v1533_v29 }
  0x43   : > { %1538 = vmatpush3.bf16.xpose.msk.msra.mxu0 %vm1946_vm1, %v1533_v29  ;;  %1569 = vmatpush3.bf16.xpose.msk.msra.mxu1 %vm1946_vm1, %v1533_v29 }
  0x44   : > { %1541 = vmatprep.subr.msk.bf16.mxu0 %vm1946_vm1, %v1539_v34  ;;  %1562 = vmatprep.subr.msk.bf16.mxu1 %vm1946_vm1, %v1539_v34 }
  0x4b   : > { %1544 = vmatpush3.bf16.xpose.msk.msra.mxu0 %vm1946_vm1, %v1539_v34  ;;  %1570 = vmatpush3.bf16.xpose.msk.msra.mxu1 %vm1946_vm1, %v1539_v34 }
  0x4c   : > { %1547 = vmatprep.subr.msk.bf16.mxu0 %vm1946_vm1, %v1545_v39  ;;  %1563 = vmatprep.subr.msk.bf16.mxu1 %vm1946_vm1, %v1545_v39 }
  0x53   : > { %1550 = vmatpush3.bf16.xpose.msk.msra.mxu0 %vm1946_vm1, %v1545_v39  ;;  %1571 = vmatpush3.bf16.xpose.msk.msra.mxu1 %vm1946_vm1, %v1545_v39 }
  0x54   : > { %1553 = vmatprep.subr.msk.bf16.mxu0 %vm1946_vm1, %v1551_v44  ;;  %1564 = vmatprep.subr.msk.bf16.mxu1 %vm1946_vm1, %v1551_v44 }
  0x5b   : > { %1556 = vmatpush3.bf16.xpose.msk.msra.mxu0 %vm1946_vm1, %v1551_v44  ;;  %1572 = vmatpush3.bf16.xpose.msk.msra.mxu1 %vm1946_vm1, %v1551_v44 }
  0x62   : > { %1462 = vmatmul.mubr.msk.f32.vlgmr.msra.gmra.mrb[0].mxu0 %vm248_vm0, %v185_v45  ;;  %1486 = vmatmul.mubr.msk.f32.vlgmr.msra.gmra.mrb[0].mxu1 %vm248_vm0, %v201_v46 }
  0x63   : > { %1464 = vmatprep.mubr.msk.f32.mxu0 %vm248_vm0, %v186_v47  ;;  %1488 = vmatprep.mubr.msk.f32.mxu1 %vm248_vm0, %v202_v48 }
  0x66   : > { %1465 = vmatmul.mubr.msk.f32.gmra.mrb[2].mxu0 %vm248_vm0, %v187_v49  ;;  %1489 = vmatmul.mubr.msk.f32.gmra.mrb[2].mxu1 %vm248_vm0, %v203_v50 }
  0x67   : > { %1467 = vmatprep.mubr.msk.f32.mxu0 %vm248_vm0, %v188_v51  ;;  %1491 = vmatprep.mubr.msk.f32.mxu1 %vm248_vm0, %v204_v52 }
  0x6a   : > { %1468 = vmatmul.mubr.msk.f32.gmra.mrb[4].mxu0 %vm248_vm0, %v189_v53  ;;  %1492 = vmatmul.mubr.msk.f32.gmra.mrb[4].mxu1 %vm248_vm0, %v205_v54 }
  0x6b   : > { %1470 = vmatprep.mubr.msk.f32.mxu0 %vm248_vm0, %v190_v55  ;;  %1494 = vmatprep.mubr.msk.f32.mxu1 %vm248_vm0, %v206_v56 }
  0x6e   : > { %1471 = vmatmul.mubr.msk.f32.gmra.mrb[6].mxu0 %vm248_vm0, %v191_v57  ;;  %1495 = vmatmul.mubr.msk.f32.gmra.mrb[6].mxu1 %vm248_vm0, %v207_v58 }
  0x6f   : > { %1473 = vmatprep.mubr.msk.f32.mxu0 %vm248_vm0, %v192_v59  ;;  %1497 = vmatprep.mubr.msk.f32.mxu1 %vm248_vm0, %v208_v60 }
  0x72   : > { %1474 = vmatmul.mubr.msk.f32.gmra.mrb[8].mxu0 %vm248_vm0, %v193_v61  ;;  %1498 = vmatmul.mubr.msk.f32.gmra.mrb[8].mxu1 %vm248_vm0, %v209_v62 }
  0x73   : > { %1476 = vmatprep.mubr.msk.f32.mxu0 %vm248_vm0, %v194_v63  ;;  %1500 = vmatprep.mubr.msk.f32.mxu1 %vm248_vm0, %v210_v0 }
  0x76   : > { %1477 = vmatmul.mubr.msk.f32.gmra.mrb[10].mxu0 %vm248_vm0, %v195_v1  ;;  %1501 = vmatmul.mubr.msk.f32.gmra.mrb[10].mxu1 %vm248_vm0, %v211_v2 }
  0x77   : > { %1479 = vmatprep.mubr.msk.f32.mxu0 %vm248_vm0, %v196_v3  ;;  %1503 = vmatprep.mubr.msk.f32.mxu1 %vm248_vm0, %v212_v4 }
  0x7a   : > { %1480 = vmatmul.mubr.msk.f32.gmra.mrb[12].mxu0 %vm248_vm0, %v197_v5  ;;  %1504 = vmatmul.mubr.msk.f32.gmra.mrb[12].mxu1 %vm248_vm0, %v213_v6 }
  0x7b   : > { %1482 = vmatprep.mubr.msk.f32.mxu0 %vm248_vm0, %v198_v7  ;;  %1506 = vmatprep.mubr.msk.f32.mxu1 %vm248_vm0, %v214_v8 }
  0x7e   : > { %1483 = vmatmul.mubr.msk.f32.gmra.mrb[14].mxu0 %vm248_vm0, %v199_v9  ;;  %1507 = vmatmul.mubr.msk.f32.gmra.mrb[14].mxu1 %vm248_vm0, %v215_v10 }
 0x135   : > { %v2155_v11 = vpop.f32.mrb[0].mxu0  ;;  %v2157_v12 = vpop.f32.mrb[0].mxu1 }
 0x136   : > { %3071 = vst [vmem:[#allocation8_spill] sm:$0xff] %v2155_v11  ;;  %v2159_v13 = vpop.f32.mrb[1].mxu0  ;;  %v2161_v14 = vpop.f32.mrb[1].mxu1 }
 0x137   : > { %3072 = vst [vmem:[#allocation9_spill] sm:$0xff] %v2159_v13 }
 0x139   : > { %v2163_v15 = vpop.f32.mrb[2].mxu0  ;;  %v2165_v16 = vpop.f32.mrb[2].mxu1 }
 0x13a   : > { %3073 = vst [vmem:[#allocation10_spill] sm:$0xff] %v2163_v15  ;;  %v2167_v17 = vpop.f32.mrb[3].mxu0  ;;  %v2169_v18 = vpop.f32.mrb[3].mxu1 }
 0x13b   : > { %3074 = vst [vmem:[#allocation11_spill] sm:$0xff] %v2167_v17 }
 0x13d   : > { %v2171_v19 = vpop.f32.mrb[4].mxu0  ;;  %v2173_v20 = vpop.f32.mrb[4].mxu1 }
 0x13e   : > { %3075 = vst [vmem:[#allocation12_spill] sm:$0xff] %v2171_v19  ;;  %v2175_v21 = vpop.f32.mrb[5].mxu0  ;;  %v2177_v22 = vpop.f32.mrb[5].mxu1 }
 0x13f   : > { %3076 = vst [vmem:[#allocation13_spill] sm:$0xff] %v2175_v21 }
 0x141   : > { %v2179_v23 = vpop.f32.mrb[6].mxu0  ;;  %v2181_v24 = vpop.f32.mrb[6].mxu1 }
 0x142   : > { %3077 = vst [vmem:[#allocation14_spill] sm:$0xff] %v2179_v23  ;;  %3078 = vst [vmem:[#allocation15_spill] sm:$0xff] %v2181_v24  ;;  %v2183_v25 = vpop.f32.mrb[7].mxu0  ;;  %v2185_v26 = vpop.f32.mrb[7].mxu1 }
 0x143   : > { %3079 = vst [vmem:[#allocation16_spill] sm:$0xff] %v2183_v25  ;;  %3080 = vst [vmem:[#allocation17_spill] sm:$0xff] %v2185_v26 }
 0x145   : > { %v2187_v27 = vpop.f32.mrb[8].mxu0  ;;  %v2189_v28 = vpop.f32.mrb[8].mxu1 }
 0x146   : > { %3081 = vst [vmem:[#allocation18_spill] sm:$0xff] %v2187_v27  ;;  %3082 = vst [vmem:[#allocation19_spill] sm:$0xff] %v2189_v28  ;;  %v2191_v29 = vpop.f32.mrb[9].mxu0  ;;  %v2193_v30 = vpop.f32.mrb[9].mxu1 }
 0x147   : > { %3083 = vst [vmem:[#allocation20_spill] sm:$0xff] %v2191_v29  ;;  %3084 = vst [vmem:[#allocation21_spill] sm:$0xff] %v2193_v30 }
 0x149   : > { %v2195_v31 = vpop.f32.mrb[10].mxu0  ;;  %v2197_v32 = vpop.f32.mrb[10].mxu1 }
 0x14a   : > { %3085 = vst [vmem:[#allocation22_spill] sm:$0xff] %v2195_v31  ;;  %3086 = vst [vmem:[#allocation23_spill] sm:$0xff] %v2197_v32  ;;  %v2199_v33 = vpop.f32.mrb[11].mxu0  ;;  %v2201_v34 = vpop.f32.mrb[11].mxu1 }
 0x14b   : > { %3087 = vst [vmem:[#allocation24_spill] sm:$0xff] %v2199_v33  ;;  %3088 = vst [vmem:[#allocation25_spill] sm:$0xff] %v2201_v34 }
 0x14d   : > { %v2203_v35 = vpop.f32.mrb[12].mxu0  ;;  %v2205_v36 = vpop.f32.mrb[12].mxu1  ;;  %627 = sbr.rel (%p2151_p0) target bundleno = 497 (0x1f1), region = 36 }
 0x14e   : > { %3089 = vst [vmem:[#allocation26_spill] sm:$0xff] %v2205_v36  ;;  %v2207_v37 = vpop.f32.mrb[13].mxu0  ;;  %v2209_v38 = vpop.f32.mrb[13].mxu1 }
 0x14f   : > { %3090 = vst [vmem:[#allocation27_spill] sm:$0xff] %v2207_v37  ;;  %3091 = vst [vmem:[#allocation28_spill] sm:$0xff] %v2209_v38 }
 0x151   : > { %v2211_v39 = vpop.f32.mrb[14].mxu0  ;;  %v2213_v40 = vpop.f32.mrb[14].mxu1 }
 0x152   : > { %3092 = vst [vmem:[#allocation29_spill] sm:$0xff] %v2213_v40  ;;  %v2215_v41 = vpop.f32.mrb[15].mxu0  ;;  %v2217_v42 = vpop.f32.mrb[15].mxu1 }
 0x153   : > { %3093 = vst [vmem:[#allocation30_spill] sm:$0xff] %v2217_v42 }
 0x154   : > { %v628_v43 = vlaneseq  ;;  %v696_v47 = vstv %s2147_s30 }
 0x156   : > { %v2225_v44 = vshrl.u32 %v628_v43, 7  ;;  %v695_v46 = vand.u32 127, %v628_v43 }
 0x158   : > { %v2228_v45 = vadd.s32 8, %v2225_v44  ;;  %v2232_v48 = vadd.s32 16, %v2225_v44  ;;  %v2235_v49 = vadd.s32 24, %v2225_v44  ;;  %v2238_v50 = vadd.s32 32, %v2225_v44 }
 0x159   : > { %v2241_v51 = vadd.s32 40, %v2225_v44  ;;  %v2244_v52 = vadd.s32 48, %v2225_v44  ;;  %v2247_v53 = vadd.s32 56, %v2225_v44  ;;  %v2250_v54 = vadd.s32 64, %v2225_v44 }
 0x15a   : > { %v2253_v55 = vadd.s32 72, %v2225_v44  ;;  %v2256_v56 = vadd.s32 80, %v2225_v44  ;;  %v2259_v57 = vadd.s32 88, %v2225_v44  ;;  %v2262_v58 = vadd.s32 96, %v2225_v44 }
 0x15b   : > { %v2265_v59 = vadd.s32 104, %v2225_v44  ;;  %v2268_v60 = vadd.s32 112, %v2225_v44  ;;  %v2271_v61 = vadd.s32 120, %v2225_v44  ;;  %v2274_v62 = vadd.s32 128, %v2225_v44 }
 0x15c   : > { %v2276_v63 = vadd.s32 %v696_v47, %v695_v46  ;;  %v2279_v0 = vadd.s32 136, %v2225_v44  ;;  %v2282_v1 = vadd.s32 144, %v2225_v44  ;;  %v2285_v2 = vadd.s32 152, %v2225_v44 }
 0x15d   : > { %v2288_v3 = vadd.s32 160, %v2225_v44  ;;  %v2291_v4 = vadd.s32 168, %v2225_v44  ;;  %v2294_v5 = vadd.s32 176, %v2225_v44  ;;  %v2297_v6 = vadd.s32 184, %v2225_v44 }
 0x15e   : > { %v2300_v7 = vadd.s32 192, %v2225_v44  ;;  %v2303_v8 = vadd.s32 200, %v2225_v44  ;;  %v2306_v9 = vadd.s32 208, %v2225_v44  ;;  %v2309_v10 = vadd.s32 216, %v2225_v44 }
 0x15f   : > { %3094 = vst [vmem:[#allocation31_spill] sm:$0xff] %v2291_v4  ;;  %3095 = vst [vmem:[#allocation32_spill] sm:$0xff] %v2294_v5  ;;  %v2312_v43 = vadd.s32 224, %v2225_v44  ;;  %v2315_v46 = vadd.s32 232, %v2225_v44  ;;  %v2318_v47 = vadd.s32 240, %v2225_v44  ;;  %v2321_v40 = vadd.s32 248, %v2225_v44 }
 0x160   : > { %3096 = vst [vmem:[#allocation33_spill] sm:$0xff] %v2297_v6  ;;  %vm698_vm2 = vcmp.eq.s32.totalorder %v2225_v44, %v2276_v63  ;;  %vm2994_vm3 = vcmp.eq.s32.totalorder %v2228_v45, %v2276_v63  ;;  %vm700_vm4 = vcmp.eq.s32.totalorder %v2232_v48, %v2276_v63  ;;  %vm701_vm5 = vcmp.eq.s32.totalorder %v2235_v49, %v2276_v63 }
 0x161   : > { %3097 = vst [vmem:[#allocation34_spill] sm:$0xff] %v2315_v46  ;;  %vm702_vm6 = vcmp.eq.s32.totalorder %v2238_v50, %v2276_v63  ;;  %vm703_vm7 = vcmp.eq.s32.totalorder %v2241_v51, %v2276_v63  ;;  %vm704_vm8 = vcmp.eq.s32.totalorder %v2244_v52, %v2276_v63  ;;  %vm705_vm9 = vcmp.eq.s32.totalorder %v2247_v53, %v2276_v63 }
 0x162   : > { %vm706_vm10 = vcmp.eq.s32.totalorder %v2250_v54, %v2276_v63  ;;  %vm707_vm11 = vcmp.eq.s32.totalorder %v2253_v55, %v2276_v63  ;;  %v731_v42 = vsel %vm698_vm2, %v2159_v13, 0.0  ;;  %v732_v36 = vsel %vm2994_vm3, %v2155_v11, 0.0 }
 0x163   : > { %vm709_vm13 = vcmp.eq.s32.totalorder %v2259_v57, %v2276_v63  ;;  %vm710_vm14 = vcmp.eq.s32.totalorder %v2262_v58, %v2276_v63  ;;  %v733_v38 = vsel %vm700_vm4, %v2167_v17, 0.0  ;;  %vm716_vm15 = vcmp.eq.s32.totalorder %v2282_v1, %v2276_v63 }
 0x164   : > { %vm717_vm0 = vcmp.eq.s32.totalorder %v2285_v2, %v2276_v63  ;;  %v763_v32 = vadd.f32 %v732_v36, %v731_v42  ;;  %v734_v34 = vsel %vm701_vm5, %v2163_v15, 0.0  ;;  %v735_v28 = vsel %vm702_vm6, %v2175_v21, 0.0 }
 0x165   : > { %v736_v36 = vsel %vm703_vm7, %v2171_v19, 0.0  ;;  %v737_v42 = vsel %vm704_vm8, %v2183_v25, 0.0  ;;  %v738_v30 = vsel %vm705_vm9, %v2179_v23, 0.0  ;;  %v739_v24 = vsel %vm706_vm10, %v2191_v29, 0.0 }
 0x166   : > { %v740_v5 = vsel %vm707_vm11, %v2187_v27, 0.0  ;;  %v764_v26 = vadd.f32 %v763_v32, %v733_v38  ;;  %vm722_vm12 = vcmp.eq.s32.totalorder %v2300_v7, %v2276_v63  ;;  %v2419_v6 = vsel %vm698_vm2, -142.85715, %v2159_v13 }
 0x167   : > { %3098 = vst [vmem:[#allocation35_spill] sm:$0xff] %v2419_v6  ;;  %vm3099_vm1 = vcmp.eq.s32.totalorder %v2228_v45, %v2276_v63  ;;  %v2431_v32 = vsel %vm702_vm6, -142.85715, %v2175_v21  ;;  %vm724_vm3 = vcmp.eq.s32.totalorder %v2306_v9, %v2276_v63  ;;  %v2439_v13 = vsel %vm700_vm4, -142.85715, %v2167_v17 }
 0x168   : > { %v2425_v4 = vsel %vm3099_vm1, -142.85715, %v2155_v11  ;;  %3101 = vst [vmem:[#allocation37_spill] sm:$0xff] %v2431_v32  ;;  %v765_v38 = vadd.f32 %v764_v26, %v734_v34  ;;  %3102 = vst [vmem:[#allocation38_spill] sm:$0xff] %v2439_v13  ;;  %v2445_v45 = vsel %vm703_vm7, -142.85715, %v2171_v19  ;;  %vm725_vm2 = vcmp.eq.s32.totalorder %v2309_v10, %v2276_v63 }
 0x169   : > { %3100 = vst [vmem:[#allocation36_spill] sm:$0xff] %v2425_v4  ;;  %3103 = vst [vmem:[#allocation39_spill] sm:$0xff] %v2445_v45  ;;  %v2451_v50 = vsel %vm704_vm8, -142.85715, %v2183_v25  ;;  %vm726_vm6 = vcmp.eq.s32.totalorder %v2312_v43, %v2276_v63  ;;  %vm3105_vm4 = vcmp.eq.s32.totalorder %v2256_v56, %v2276_v63  ;;  %v742_v34 = vsel %vm709_vm13, %v2195_v31, 0.0 }
 0x16a   : > { %3104 = vst [vmem:[#allocation40_spill] sm:$0xff] %v2451_v50  ;;  %v741_v26 = vsel %vm3105_vm4, %v2199_v33, 0.0  ;;  %v2469_v48 = vsel %vm701_vm5, -142.85715, %v2163_v15  ;;  %v2475_v51 = vsel %vm705_vm9, -142.85715, %v2179_v23  ;;  %vm727_vm7 = vcmp.eq.s32.totalorder %v2315_v46, %v2276_v63  ;;  %vm3110_vm9 = vmmov %vm3105_vm4 }
 0x16b   : > { %3106 = vst [vmem:[#allocation41_spill] sm:$0xff] %v2469_v48  ;;  %3107 = vst [vmem:[#allocation42_spill] sm:$0xff] %v2475_v51  ;;  %v766_v52 = vadd.f32 %v765_v38, %v735_v28  ;;  %v2483_v17 = vsel %vm706_vm10, -142.85715, %v2191_v29  ;;  %v2489_v49 = vsel %vm707_vm11, -142.85715, %v2187_v27  ;;  %v835_v53 = vmax.f32 %v2419_v6, %v2431_v32 }
 0x16c   : > { %3108 = vst [vmem:[#allocation43_spill] sm:$0xff] %v2483_v17  ;;  %3109 = vst [vmem:[#allocation44_spill] sm:$0xff] %v2489_v49  ;;  %vm728_vm5 = vcmp.eq.s32.totalorder %v2318_v47, %v2276_v63  ;;  %vm729_vm8 = vcmp.eq.s32.totalorder %v2321_v40, %v2276_v63  ;;  %v2501_v28 = vsel %vm3110_vm9, -142.85715, %v2199_v33  ;;  %v2507_v54 = vsel %vm709_vm13, -142.85715, %v2195_v31 }
 0x16d   : > { %3111 = vst [vmem:[#allocation45_spill] sm:$0xff] %v2501_v28  ;;  %3112 = vst [vmem:[#allocation46_spill] sm:$0xff] %v2507_v54  ;;  %v836_v55 = vmax.f32 %v2425_v4, %v2445_v45  ;;  %v837_v38 = vmax.f32 %v2439_v13, %v2451_v50  ;;  %v767_v27 = vadd.f32 %v766_v52, %v736_v36  ;;  %v2517_v56 = vsel %vm710_vm14, -142.85715, %v2207_v37  ;;  %v3128_v50 = vld [vmem:[#allocation31_spill] sm:$0xff] }
 0x16e   : > { %3113 = vst [vmem:[#allocation47_spill] sm:$0xff] %v2517_v56  ;;  %vm3114_vm10 = vcmp.eq.s32.totalorder %v2265_v59, %v2276_v63  ;;  %vm3116_vm11 = vcmp.eq.s32.totalorder %v2268_v60, %v2276_v63  ;;  %vm3118_vm13 = vcmp.eq.s32.totalorder %v2271_v61, %v2276_v63  ;;  %vm3120_vm1 = vcmp.eq.s32.totalorder %v2274_v62, %v2276_v63 }
 0x16f   : > { %v2523_v57 = vsel %vm3114_vm10, -142.85715, %v2203_v35  ;;  %v2529_v31 = vsel %vm3116_vm11, -142.85715, %v2215_v41  ;;  %v2535_v36 = vsel %vm3118_vm13, -142.85715, %v2211_v39  ;;  %vm3122_vm4 = vcmp.eq.s32.totalorder %v2279_v0, %v2276_v63 }
 0x170   : > { %3115 = vst [vmem:[#allocation48_spill] sm:$0xff] %v2523_v57  ;;  %3117 = vst [vmem:[#allocation49_spill] sm:$0xff] %v2529_v31  ;;  %v2541_v52 = vsel %vm3120_vm1, -142.85715, %v2161_v14  ;;  %v2547_v33 = vsel %vm3122_vm4, -142.85715, %v2157_v12  ;;  %v838_v29 = vmax.f32 %v2469_v48, %v2475_v51  ;;  %v768_v15 = vadd.f32 %v767_v27, %v737_v42 }
 0x171   : > { %3119 = vst [vmem:[#allocation50_spill] sm:$0xff] %v2535_v36  ;;  %3121 = vst [vmem:[#allocation51_spill] sm:$0xff] %v2541_v52  ;;  %v2555_v23 = vsel %vm716_vm15, -142.85715, %v2169_v18  ;;  %v2561_v25 = vsel %vm717_vm0, -142.85715, %v2165_v16  ;;  %v839_v11 = vmax.f32 %v835_v53, %v2483_v17  ;;  %vm3126_vm9 = vcmp.eq.s32.totalorder %v2288_v3, %v2276_v63 }
 0x172   : > { %3123 = vst [vmem:[#allocation52_spill] sm:$0xff] %v2547_v33  ;;  %3124 = vst [vmem:[#allocation53_spill] sm:$0xff] %v2555_v23  ;;  %v2568_v19 = vsel %vm3126_vm9, -142.85715, %v2177_v22  ;;  %v840_v27 = vmax.f32 %v836_v55, %v2489_v49  ;;  %v841_v42 = vmax.f32 %v837_v38, %v2501_v28  ;;  %v842_v21 = vmax.f32 %v838_v29, %v2507_v54  ;;  %v3130_v53 = vld [vmem:[#allocation17_spill] sm:$0xff]  ;;  %v3131_v17 = vld [vmem:[#allocation32_spill] sm:$0xff] }
 0x173   : > { %3125 = vst [vmem:[#allocation54_spill] sm:$0xff] %v2561_v25  ;;  %3127 = vst [vmem:[#allocation55_spill] sm:$0xff] %v2568_v19  ;;  %v769_v51 = vadd.f32 %v768_v15, %v738_v30  ;;  %vm3129_vm10 = vcmp.eq.s32.totalorder %v3128_v50, %v2276_v63  ;;  %vm3132_vm11 = vcmp.eq.s32.totalorder %v3131_v17, %v2276_v63  ;;  %v3134_v55 = vld [vmem:[#allocation15_spill] sm:$0xff]  ;;  %v3135_v49 = vld [vmem:[#allocation33_spill] sm:$0xff] }
 0x174   : > { %v2577_v45 = vsel %vm3129_vm10, -142.85715, %v2173_v20  ;;  %v2583_v32 = vsel %vm3132_vm11, -142.85715, %v3130_v53  ;;  %v843_v48 = vmax.f32 %v839_v11, %v2517_v56  ;;  %vm3136_vm13 = vcmp.eq.s32.totalorder %v3135_v49, %v2276_v63  ;;  %v3138_v28 = vld [vmem:[#allocation21_spill] sm:$0xff]  ;;  %v3140_v11 = vld [vmem:[#allocation19_spill] sm:$0xff] }
 0x175   : > { %3133 = vst [vmem:[#allocation31_spill] sm:$0xff] %v2583_v32  ;;  %v2590_v29 = vsel %vm3136_vm13, -142.85715, %v3134_v55  ;;  %v844_v15 = vmax.f32 %v840_v27, %v2523_v57  ;;  %v845_v30 = vmax.f32 %v841_v42, %v2529_v31  ;;  %v846_v38 = vmax.f32 %v842_v21, %v2535_v36  ;;  %v3142_v27 = vld [vmem:[#allocation25_spill] sm:$0xff]  ;;  %v3143_v31 = vld [vmem:[#allocation23_spill] sm:$0xff] }
 0x176   : > { %3137 = vst [vmem:[#allocation32_spill] sm:$0xff] %v2590_v29  ;;  %v770_v54 = vadd.f32 %v769_v51, %v739_v24  ;;  %v2599_v13 = vsel %vm722_vm12, -142.85715, %v3138_v28  ;;  %vm3141_vm1 = vcmp.eq.s32.totalorder %v2303_v8, %v2276_v63  ;;  %v847_v4 = vmax.f32 %v843_v48, %v2541_v52  ;;  %v3144_v48 = vld [vmem:[#allocation28_spill] sm:$0xff]  ;;  %v3169_v40 = vld [vmem:[#allocation45_spill] sm:$0xff] }
 0x177   : > { %3139 = vst [vmem:[#allocation33_spill] sm:$0xff] %v2599_v13  ;;  %v2605_v56 = vsel %vm3141_vm1, -142.85715, %v3140_v11  ;;  %v2612_v21 = vsel %vm724_vm3, -142.85715, %v3142_v27  ;;  %v848_v24 = vmax.f32 %v844_v15, %v2547_v33  ;;  %v849_v51 = vmax.f32 %v845_v30, %v2555_v23  ;;  %v3145_v15 = vld [vmem:[#allocation26_spill] sm:$0xff] }
 0x178   : > { %v850_v42 = vmax.f32 %v846_v38, %v2561_v25  ;;  %v771_v36 = vadd.f32 %v770_v54, %v740_v5  ;;  %v2621_v57 = vsel %vm725_vm2, -142.85715, %v3143_v31  ;;  %v2627_v52 = vsel %vm726_vm6, -142.85715, %v3144_v48  ;;  %v3146_v23 = vld [vmem:[#allocation30_spill] sm:$0xff] }
 0x179   : > { %v851_v6 = vmax.f32 %v847_v4, %v2568_v19  ;;  %v2634_v30 = vsel %vm727_vm7, -142.85715, %v3145_v15  ;;  %v852_v5 = vmax.f32 %v848_v24, %v2577_v45  ;;  %v853_v54 = vmax.f32 %v849_v51, %v2583_v32  ;;  %v3147_v4 = vld [vmem:[#allocation29_spill] sm:$0xff] }
 0x17a   : > { %v854_v38 = vmax.f32 %v850_v42, %v2590_v29  ;;  %v772_v25 = vadd.f32 %v771_v36, %v741_v26  ;;  %v2643_v33 = vsel %vm728_vm5, -142.85715, %v3146_v23  ;;  %v2649_v19 = vsel %vm729_vm8, -142.85715, %v3147_v4 }
 0x17b   : > { %v855_v46 = vmax.f32 %v851_v6, %v2599_v13  ;;  %v743_v24 = vsel %vm710_vm14, %v2207_v37, 0.0  ;;  %v856_v26 = vmax.f32 %v852_v5, %v2605_v56  ;;  %v857_v36 = vmax.f32 %v853_v54, %v2612_v21 }
 0x17c   : > { %v858_v51 = vmax.f32 %v854_v38, %v2621_v57  ;;  %v773_v42 = vadd.f32 %v772_v25, %v742_v34  ;;  %vm3148_vm4 = vcmp.eq.s32.totalorder %v2265_v59, %v2276_v63  ;;  %vm3149_vm14 = vcmp.eq.s32.totalorder %v2268_v60, %v2276_v63 }
 0x17d   : > { %v859_v29 = vmax.f32 %v855_v46, %v2627_v52  ;;  %v744_v32 = vsel %vm3148_vm4, %v2203_v35, 0.0  ;;  %v860_v6 = vmax.f32 %v856_v26, %v2634_v30  ;;  %v861_v13 = vmax.f32 %v857_v36, %v2643_v33 }
 0x17e   : > { %v862_v58 = vmax.f32 %v858_v51, %v2649_v19  ;;  %v774_v37 = vadd.f32 %v773_v42, %v743_v24  ;;  %v745_v5 = vsel %vm3149_vm14, %v2215_v41, 0.0  ;;  %vm3150_vm9 = vcmp.eq.s32.totalorder %v2271_v61, %v2276_v63 }
 0x17f   : > { %v863_v25 = vmax.f32 %v859_v29, %v860_v6  ;;  %v746_v59 = vsel %vm3150_vm9, %v2211_v39, 0.0  ;;  %vm3151_vm10 = vcmp.eq.s32.totalorder %v2274_v62, %v2276_v63  ;;  %vm3152_vm11 = vcmp.eq.s32.totalorder %v2279_v0, %v2276_v63 }
 0x180   : > { %v864_v34 = vmax.f32 %v861_v13, %v862_v58  ;;  %v775_v46 = vadd.f32 %v774_v37, %v744_v32  ;;  %v747_v24 = vsel %vm3151_vm10, %v2161_v14, 0.0  ;;  %v748_v13 = vsel %vm3152_vm11, %v2157_v12, 0.0 }
 0x181   : > { %v749_v61 = vsel %vm716_vm15, %v2169_v18, 0.0  ;;  %v750_v62 = vsel %vm717_vm0, %v2165_v16, 0.0  ;;  %vm3153_vm13 = vcmp.eq.s32.totalorder %v2288_v3, %v2276_v63  ;;  %vm3154_vm15 = vcmp.eq.s32.totalorder %v3128_v50, %v2276_v63 }
 0x182   : > { %v865_v54 = vmax.f32 %v863_v25, %v864_v34  ;;  %v776_v38 = vadd.f32 %v775_v46, %v745_v5  ;;  %v751_v0 = vsel %vm3153_vm13, %v2177_v22, 0.0  ;;  %v2695_v5 = vld [vmem:[#allocation2] sm:$0x1]  ;;  %v752_v1 = vsel %vm3154_vm15, %v2173_v20, 0.0 }
 0x183   : > { %vm3155_vm0 = vcmp.eq.s32.totalorder %v3131_v17, %v2276_v63  ;;  %vm3156_vm1 = vcmp.eq.s32.totalorder %v3135_v49, %v2276_v63  ;;  %v755_v17 = vsel %vm722_vm12, %v3138_v28, 0.0  ;;  %vm3157_vm4 = vcmp.eq.s32.totalorder %v2303_v8, %v2276_v63  ;;  %v3160_v8 = vld [vmem:[#allocation38_spill] sm:$0xff] }
 0x184   : > { %v866_v26 = vrot.slane %v865_v54, 4  ;;  %v777_v36 = vadd.f32 %v776_v38, %v746_v59  ;;  %v753_v2 = vsel %vm3155_vm0, %v3130_v53, 0.0  ;;  %v881_v59 = vsub.s32 0, %v2225_v44 }
 0x185   : > { %v756_v44 = vsel %vm3157_vm4, %v3140_v11, 0.0  ;;  %v758_v28 = vsel %vm725_vm2, %v3143_v31, 0.0  ;;  %v760_v10 = vsel %vm727_vm7, %v3145_v15, 0.0  ;;  %v761_v43 = vsel %vm728_vm5, %v3146_v23, 0.0  ;;  %v3167_v23 = vld [vmem:[#allocation43_spill] sm:$0xff] }
 0x186   : > { %v867_v37 = vmax.f32 %v865_v54, %v866_v26  ;;  %v778_v60 = vadd.f32 %v777_v36, %v747_v24  ;;  %v754_v54 = vsel %vm3156_vm1, %v3134_v55, 0.0  ;;  %v757_v55 = vsel %vm724_vm3, %v3142_v27, 0.0  ;;  %v3158_v36 = vld [vmem:[#allocation35_spill] sm:$0xff] }
 0x187   : > { %v759_v27 = vsel %vm726_vm6, %v3144_v48, 0.0  ;;  %v3165_v48 = vld [vmem:[#allocation40_spill] sm:$0xff] }
 0x188   : > { %v868_v32 = vrot.slane %v867_v37, 2  ;;  %v779_v29 = vadd.f32 %v778_v60, %v748_v13  ;;  %v3159_v13 = vld [vmem:[#allocation36_spill] sm:$0xff]  ;;  %v3161_v60 = vld [vmem:[#allocation41_spill] sm:$0xff] }
 0x18a   : > { %v869_v51 = vmax.f32 %v867_v37, %v868_v32  ;;  %v780_v42 = vadd.f32 %v779_v29, %v749_v61  ;;  %v3162_v32 = vld [vmem:[#allocation37_spill] sm:$0xff] }
 0x18c   : > { %v870_v6 = vrot.slane %v869_v51, 1  ;;  %v781_v58 = vadd.f32 %v780_v42, %v750_v62  ;;  %v3164_v42 = vld [vmem:[#allocation39_spill] sm:$0xff] }
 0x18e   : > { %v871_v25 = vmax.f32 %v869_v51, %v870_v6  ;;  %v782_v34 = vadd.f32 %v781_v58, %v751_v0 }
 0x190   : > { %v2706_v46 = vmax.f32 %v2695_v5, %v871_v25  ;;  %v783_v3 = vadd.f32 %v782_v34, %v752_v1 }
 0x192   : > { %v874_v50 = vsub.f32 %v2695_v5, %v2706_v46  ;;  %1019 = vst [vmem:[#allocation2] sm:$0x1] %v2706_v46  ;;  %v784_v38 = vadd.f32 %v783_v3, %v753_v2  ;;  %v2721_v24 = vrot.slane %v2706_v46, %v881_v59  ;;  %v762_v3 = vsel %vm729_vm8, %v3147_v4, 0.0  ;;  %v3166_v59 = vld [vmem:[#allocation42_spill] sm:$0xff] }
 0x194   : > { %v785_v53 = vadd.f32 %v784_v38, %v754_v54  ;;  %v884_v7 = vsub.f32 %v3158_v36, %v2721_v24  ;;  %v885_v37 = vsub.f32 %v3159_v13, %v2721_v24  ;;  %v886_v11 = vsub.f32 %v3160_v8, %v2721_v24 }
 0x195   : > { %v887_v61 = vsub.f32 %v3161_v60, %v2721_v24  ;;  %v888_v29 = vsub.f32 %v3162_v32, %v2721_v24  ;;  %v889_v0 = vsub.f32 %v3164_v42, %v2721_v24  ;;  %v890_v34 = vsub.f32 %v3165_v48, %v2721_v24  ;;  %v3171_v32 = vld [vmem:[#allocation47_spill] sm:$0xff]  ;;  %v3172_v42 = vld [vmem:[#allocation48_spill] sm:$0xff]  ;;  %v3173_v48 = vld [vmem:[#allocation49_spill] sm:$0xff] }
 0x196   : > { %v786_v49 = vadd.f32 %v785_v53, %v755_v17  ;;  %v916_v51 = vmul.f32 1.442695, %v884_v7  ;;  %v918_v6 = vmul.f32 1.442695, %v885_v37  ;;  %v920_v58 = vmul.f32 1.442695, %v886_v11 }
 0x197   : > { %v922_v1 = vmul.f32 1.442695, %v887_v61  ;;  %v924_v15 = vmul.f32 1.442695, %v888_v29  ;;  %v891_v54 = vsub.f32 %v3166_v59, %v2721_v24  ;;  %v926_v38 = vmul.f32 1.442695, %v889_v0 }
 0x198   : > { %v787_v26 = vadd.f32 %v786_v49, %v756_v44  ;;  %1630 = vpow2.f32 %v916_v51  ;;  %v892_v47 = vsub.f32 %v3167_v23, %v2721_v24  ;;  %v928_v53 = vmul.f32 1.442695, %v890_v34  ;;  %v3168_v49 = vld [vmem:[#allocation44_spill] sm:$0xff]  ;;  %v3170_v37 = vld [vmem:[#allocation46_spill] sm:$0xff] }
 0x199   : > { %1632 = vpow2.f32 %v918_v6  ;;  %v894_v63 = vsub.f32 %v3169_v40, %v2721_v24  ;;  %v895_v8 = vsub.f32 %v3170_v37, %v2721_v24  ;;  %v896_v29 = vsub.f32 %v3171_v32, %v2721_v24  ;;  %v3176_v40 = vld [vmem:[#allocation52_spill] sm:$0xff] }
 0x19a   : > { %v788_v9 = vadd.f32 %v787_v26, %v757_v55  ;;  %1634 = vpow2.f32 %v920_v58  ;;  %v893_v55 = vsub.f32 %v3168_v49, %v2721_v24  ;;  %v930_v26 = vmul.f32 1.442695, %v891_v54  ;;  %v3174_v54 = vld [vmem:[#allocation50_spill] sm:$0xff] }
 0x19b   : > { %1636 = vpow2.f32 %v922_v1  ;;  %v932_v4 = vmul.f32 1.442695, %v892_v47  ;;  %v936_v31 = vmul.f32 1.442695, %v894_v63  ;;  %v897_v0 = vsub.f32 %v3172_v42, %v2721_v24 }
 0x19c   : > { %v789_v62 = vadd.f32 %v788_v9, %v758_v28  ;;  %1638 = vpow2.f32 %v924_v15  ;;  %v934_v11 = vmul.f32 1.442695, %v893_v55  ;;  %v938_v6 = vmul.f32 1.442695, %v895_v8 }
 0x19d   : > { %1640 = vpow2.f32 %v926_v38  ;;  %v898_v34 = vsub.f32 %v3173_v48, %v2721_v24  ;;  %v940_v15 = vmul.f32 1.442695, %v896_v29  ;;  %v899_v38 = vsub.f32 %v3174_v54, %v2721_v24 }
 0x19e   : > { %v790_v25 = vadd.f32 %v789_v62, %v759_v27  ;;  %1642 = vpow2.f32 %v928_v53  ;;  %v901_v63 = vsub.f32 %v3176_v40, %v2721_v24 }
 0x19f   : > { %1644 = vpow2.f32 %v930_v26  ;;  %v944_v55 = vmul.f32 1.442695, %v898_v34 }
 0x1a0   : > { %v791_v2 = vadd.f32 %v790_v25, %v760_v10  ;;  %1646 = vpow2.f32 %v932_v4  ;;  %v946_v4 = vmul.f32 1.442695, %v899_v38 }
 0x1a1   : > { %1648 = vpow2.f32 %v934_v11 }
 0x1a2   : > { %v792_v17 = vadd.f32 %v791_v2, %v761_v43  ;;  %v1631_v7 = vpop.eup %1630  ;;  %v730_v43 = vld [vmem:[#allocation4] sm:$0x1]  ;;  %1650 = vpow2.f32 %v936_v31 }
 0x1a3   : > { %v1633_v13 = vpop.eup %1632  ;;  %1652 = vpow2.f32 %v938_v6  ;;  %v3179_v31 = vld [vmem:[#allocation55_spill] sm:$0xff] }
 0x1a4   : > { %v793_v44 = vadd.f32 %v792_v17, %v762_v3  ;;  %v1635_v60 = vpop.eup %1634  ;;  %v980_v9 = vadd.f32 %v1633_v13, %v1631_v7  ;;  %v942_v17 = vmul.f32 1.442695, %v897_v0  ;;  %1654 = vpow2.f32 %v940_v15  ;;  %v3177_v13 = vld [vmem:[#allocation53_spill] sm:$0xff] }
 0x1a5   : > { %v1637_v27 = vpop.eup %1636  ;;  %v902_v37 = vsub.f32 %v3177_v13, %v2721_v24  ;;  %v905_v0 = vsub.f32 %v2577_v45, %v2721_v24  ;;  %v3182_v45 = vld [vmem:[#allocation33_spill] sm:$0xff] }
 0x1a6   : > { %v794_v36 = vrot.slane %v793_v44, 4  ;;  %v981_v62 = vadd.f32 %v1635_v60, %v980_v9  ;;  %v1639_v51 = vpop.eup %1638  ;;  %1656 = vpow2.f32 %v942_v17  ;;  %v908_v17 = vsub.f32 %v3182_v45, %v2721_v24 }
 0x1a7   : > { %v1641_v25 = vpop.eup %1640  ;;  %1658 = vpow2.f32 %v944_v55 }
 0x1a8   : > { %v795_v28 = vadd.f32 %v794_v36, %v793_v44  ;;  %v982_v1 = vadd.f32 %v1637_v27, %v981_v62  ;;  %v1643_v59 = vpop.eup %1642  ;;  %v3175_v44 = vld [vmem:[#allocation51_spill] sm:$0xff]  ;;  %1660 = vpow2.f32 %v946_v4  ;;  %v950_v27 = vmul.f32 1.442695, %v901_v63 }
 0x1a9   : > { %v1645_v53 = vpop.eup %1644  ;;  %v900_v49 = vsub.f32 %v3175_v44, %v2721_v24  ;;  %v952_v62 = vmul.f32 1.442695, %v902_v37  ;;  %v909_v44 = vsub.f32 %v2605_v56, %v2721_v24  ;;  %v964_v40 = vmul.f32 1.442695, %v908_v17 }
 0x1aa   : > { %v796_v61 = vrot.slane %v795_v28, 2  ;;  %v983_v3 = vadd.f32 %v1639_v51, %v982_v1  ;;  %v1647_v36 = vpop.eup %1646  ;;  %v912_v56 = vsub.f32 %v2627_v52, %v2721_v24  ;;  %v915_v52 = vsub.f32 %v2649_v19, %v2721_v24 }
 0x1ab   : > { %v948_v8 = vmul.f32 1.442695, %v900_v49 }
 0x1ac   : > { %v797_v10 = vadd.f32 %v796_v61, %v795_v28  ;;  %v984_v47 = vadd.f32 %v1641_v25, %v983_v3  ;;  %v1649_v28 = vpop.eup %1648  ;;  %v3178_v61 = vld [vmem:[#allocation54_spill] sm:$0xff]  ;;  %v3180_v25 = vld [vmem:[#allocation31_spill] sm:$0xff] }
 0x1ad   : > { %v1651_v60 = vpop.eup %1650  ;;  %v903_v9 = vsub.f32 %v3178_v61, %v2721_v24  ;;  %1662 = vpow2.f32 %v948_v8 }
 0x1ae   : > { %v798_v58 = vrot.slane %v797_v10, 1  ;;  %v985_v26 = vadd.f32 %v1643_v59, %v984_v47  ;;  %v1653_v29 = vpop.eup %1652  ;;  %1664 = vpow2.f32 %v950_v27  ;;  %v958_v59 = vmul.f32 1.442695, %v905_v0 }
 0x1af   : > { %v1655_v42 = vpop.eup %1654  ;;  %v954_v6 = vmul.f32 1.442695, %v903_v9  ;;  %1666 = vpow2.f32 %v952_v62 }
 0x1b0   : > { %v799_v2 = vadd.f32 %v798_v58, %v797_v10  ;;  %v986_v7 = vadd.f32 %v1645_v53, %v985_v26  ;;  %v904_v10 = vsub.f32 %v3179_v31, %v2721_v24  ;;  %v1657_v1 = vpop.eup %1656 }
 0x1b1   : > { %v1659_v15 = vpop.eup %1658  ;;  %1668 = vpow2.f32 %v954_v6  ;;  %v978_v6 = vmul.f32 1.442695, %v915_v52 }
 0x1b2   : > { %v800_v23 = vadd.f32 %v799_v2, %v730_v43  ;;  %v987_v11 = vadd.f32 %v1647_v36, %v986_v7  ;;  %v906_v43 = vsub.f32 %v3180_v25, %v2721_v24  ;;  %v956_v48 = vmul.f32 1.442695, %v904_v10  ;;  %v3181_v2 = vld [vmem:[#allocation32_spill] sm:$0xff]  ;;  %v1661_v38 = vpop.eup %1660 }
 0x1b3   : > { %v907_v3 = vsub.f32 %v3181_v2, %v2721_v24  ;;  %v910_v36 = vsub.f32 %v2612_v21, %v2721_v24  ;;  %v911_v7 = vsub.f32 %v2621_v57, %v2721_v24  ;;  %v913_v21 = vsub.f32 %v2634_v30, %v2721_v24 }
 0x1b4   : > { %801 = vst [vmem:[#allocation4] sm:$0x1] %v800_v23  ;;  %v988_v32 = vadd.f32 %v1649_v28, %v987_v11  ;;  %1670 = vpow2.f32 %v956_v48  ;;  %v960_v23 = vmul.f32 1.442695, %v906_v43  ;;  %v966_v28 = vmul.f32 1.442695, %v909_v44 }
 0x1b5   : > { %1672 = vpow2.f32 %v958_v59  ;;  %v962_v49 = vmul.f32 1.442695, %v907_v3  ;;  %v968_v8 = vmul.f32 1.442695, %v910_v36  ;;  %v970_v61 = vmul.f32 1.442695, %v911_v7 }
 0x1b6   : > { %v989_v51 = vadd.f32 %v1651_v60, %v988_v32  ;;  %1674 = vpow2.f32 %v960_v23  ;;  %v914_v57 = vsub.f32 %v2643_v33, %v2721_v24  ;;  %v972_v32 = vmul.f32 1.442695, %v912_v56 }
 0x1b7   : > { %v1663_v53 = vpop.eup %1662  ;;  %1676 = vpow2.f32 %v962_v49  ;;  %v974_v10 = vmul.f32 1.442695, %v913_v21  ;;  %v875_v2 = vmul.f32 1.442695, %v874_v50  ;;  %v873_v49 = vld [vmem:[#allocation3] sm:$0x1] }
 0x1b8   : > { %v990_v58 = vadd.f32 %v1653_v29, %v989_v51  ;;  %v1665_v26 = vpop.eup %1664  ;;  %1678 = vpow2.f32 %v964_v40  ;;  %v976_v30 = vmul.f32 1.442695, %v914_v57 }
 0x1b9   : > { %v1667_v4 = vpop.eup %1666  ;;  %1680 = vpow2.f32 %v966_v28 }
 0x1ba   : > { %v991_v34 = vadd.f32 %v1655_v42, %v990_v58  ;;  %1682 = vpow2.f32 %v968_v8 }
 0x1bb   : > { %v1669_v37 = vpop.eup %1668  ;;  %1684 = vpow2.f32 %v970_v61 }
 0x1bc   : > { %v992_v54 = vadd.f32 %v1657_v1, %v991_v34  ;;  %1686 = vpow2.f32 %v972_v32 }
 0x1bd   : > { %1688 = vpow2.f32 %v974_v10 }
 0x1be   : > { %v993_v47 = vadd.f32 %v1659_v15, %v992_v54  ;;  %v1671_v60 = vpop.eup %1670  ;;  %1690 = vpow2.f32 %v976_v30 }
 0x1bf   : > { %v1673_v27 = vpop.eup %1672  ;;  %1692 = vpow2.f32 %v978_v6 }
 0x1c0   : > { %v994_v55 = vadd.f32 %v1661_v38, %v993_v47  ;;  %v1675_v31 = vpop.eup %1674  ;;  %1694 = vpow2.f32 %v875_v2 }
 0x1c1   : > { %v1677_v51 = vpop.eup %1676 }
 0x1c2   : > { %v995_v63 = vadd.f32 %v1663_v53, %v994_v55  ;;  %v1679_v0 = vpop.eup %1678 }
 0x1c3   : > { %v1681_v1 = vpop.eup %1680 }
 0x1c4   : > { %v996_v13 = vadd.f32 %v1665_v26, %v995_v63  ;;  %v1683_v25 = vpop.eup %1682 }
 0x1c5   : > { %v1685_v48 = vpop.eup %1684 }
 0x1c6   : > { %v997_v11 = vadd.f32 %v1667_v4, %v996_v13  ;;  %v1687_v19 = vpop.eup %1686 }
 0x1c7   : > { %v1689_v15 = vpop.eup %1688 }
 0x1c8   : > { %v998_v9 = vadd.f32 %v1669_v37, %v997_v11  ;;  %v1691_v59 = vpop.eup %1690 }
 0x1c9   : > { %v1693_v38 = vpop.eup %1692 }
 0x1ca   : > { %v999_v29 = vadd.f32 %v1671_v60, %v998_v9  ;;  %v1695_v44 = vpop.eup %1694 }
 0x1cb   : > { %v877_v26 = vmul.f32 %v1695_v44, %v873_v49 }
 0x1cc   : > { %v1000_v62 = vadd.f32 %v1673_v27, %v999_v29 }
 0x1ce   : > { %v1001_v42 = vadd.f32 %v1675_v31, %v1000_v62 }
 0x1d0   : > { %v1002_v58 = vadd.f32 %v1677_v51, %v1001_v42 }
 0x1d2   : > { %v1003_v33 = vadd.f32 %v1679_v0, %v1002_v58 }
 0x1d4   : > { %v1004_v43 = vadd.f32 %v1681_v1, %v1003_v33 }
 0x1d6   : > { %v1005_v34 = vadd.f32 %v1683_v25, %v1004_v43 }
 0x1d8   : > { %v1006_v24 = vadd.f32 %v1685_v48, %v1005_v34 }
 0x1da   : > { %v1007_v3 = vadd.f32 %v1687_v19, %v1006_v24 }
 0x1dc   : > { %v1008_v54 = vadd.f32 %v1689_v15, %v1007_v3 }
 0x1de   : > { %v1009_v45 = vadd.f32 %v1691_v59, %v1008_v54 }
 0x1e0   : > { %v1010_v17 = vadd.f32 %v1693_v38, %v1009_v45 }
 0x1e2   : > { %v1011_v23 = vrot.slane %v1010_v17, 4 }
 0x1e4   : > { %v1012_v47 = vadd.f32 %v1011_v23, %v1010_v17 }
 0x1e6   : > { %v1013_v53 = vrot.slane %v1012_v47, 2 }
 0x1e8   : > { %v1014_v55 = vadd.f32 %v1013_v53, %v1012_v47 }
 0x1ea   : > { %v1015_v36 = vrot.slane %v1014_v55, 1 }
 0x1ec   : > { %v1016_v40 = vadd.f32 %v1015_v36, %v1014_v55 }
 0x1ee   : > { %v1017_v63 = vadd.f32 %v1016_v40, %v877_v26 }
 0x1f0   : > { %1018 = vst [vmem:[#allocation3] sm:$0x1] %v1017_v63 }
 0x1f1 PF: > { %1022 = sbr.rel (!%p2151_p0) target bundleno = 627 (0x273), region = 40  ;;  %v3183_v5 = vld [vmem:[#allocation13_spill] sm:$0xff] (%p2151_p0)  ;;  %v3185_v4 = vld [vmem:[#allocation12_spill] sm:$0xff] (%p2151_p0)  ;;  %v3188_v37 = vld [vmem:[#allocation11_spill] sm:$0xff] (%p2151_p0) }
 0x1f2   : > { %v3184_v46 = vld [vmem:[#allocation9_spill] sm:$0xff] (%p2151_p0)  ;;  %v3186_v7 = vld [vmem:[#allocation8_spill] sm:$0xff] (%p2151_p0)  ;;  %v3189_v8 = vld [vmem:[#allocation14_spill] sm:$0xff] (%p2151_p0) }
 0x1f3   : > { %v1024_v50 = vmax.f32 (%p2151_p0), %v3184_v46, %v3183_v5  ;;  %v1025_v28 = vmax.f32 (%p2151_p0), %v3186_v7, %v3185_v4  ;;  %v3187_v13 = vld [vmem:[#allocation16_spill] sm:$0xff] (%p2151_p0)  ;;  %v3190_v11 = vld [vmem:[#allocation10_spill] sm:$0xff] (%p2151_p0)  ;;  %v3195_v52 = vld [vmem:[#allocation27_spill] sm:$0xff] (%p2151_p0) }
 0x1f4   : > { %v1026_v56 = vmax.f32 (%p2151_p0), %v3188_v37, %v3187_v13  ;;  %v1027_v60 = vmax.f32 (%p2151_p0), %v3190_v11, %v3189_v8  ;;  %v3191_v21 = vld [vmem:[#allocation20_spill] sm:$0xff] (%p2151_p0)  ;;  %v3192_v9 = vld [vmem:[#allocation18_spill] sm:$0xff] (%p2151_p0)  ;;  %v3196_v25 = vld [vmem:[#allocation17_spill] sm:$0xff] (%p2151_p0) }
 0x1f5   : > { %v1028_v61 = vmax.f32 (%p2151_p0), %v1024_v50, %v3191_v21  ;;  %v1029_v27 = vmax.f32 (%p2151_p0), %v1025_v28, %v3192_v9  ;;  %v3193_v57 = vld [vmem:[#allocation24_spill] sm:$0xff] (%p2151_p0)  ;;  %v3194_v29 = vld [vmem:[#allocation22_spill] sm:$0xff] (%p2151_p0)  ;;  %v3197_v48 = vld [vmem:[#allocation15_spill] sm:$0xff] (%p2151_p0) }
 0x1f6   : > { %v1030_v32 = vmax.f32 (%p2151_p0), %v1026_v56, %v3193_v57  ;;  %v1031_v31 = vmax.f32 (%p2151_p0), %v1027_v60, %v3194_v29  ;;  %v3198_v19 = vld [vmem:[#allocation21_spill] sm:$0xff] (%p2151_p0)  ;;  %v3199_v15 = vld [vmem:[#allocation19_spill] sm:$0xff] (%p2151_p0)  ;;  %v3202_v45 = vld [vmem:[#allocation28_spill] sm:$0xff] (%p2151_p0)  ;;  %v1068_v56 = vlaneseq (%p2151_p0) }
 0x1f7   : > { %v1032_v10 = vmax.f32 (%p2151_p0), %v1028_v61, %v3195_v52  ;;  %v1033_v62 = vmax.f32 (%p2151_p0), %v1029_v27, %v2203_v35  ;;  %v3200_v3 = vld [vmem:[#allocation25_spill] sm:$0xff] (%p2151_p0)  ;;  %v3201_v54 = vld [vmem:[#allocation23_spill] sm:$0xff] (%p2151_p0)  ;;  %v3203_v23 = vld [vmem:[#allocation26_spill] sm:$0xff] (%p2151_p0) }
 0x1f8   : > { %v1034_v51 = vmax.f32 %v1030_v32, %v2215_v41  ;;  %v1035_v30 = vmax.f32 %v1031_v31, %v2211_v39  ;;  %v3204_v53 = vld [vmem:[#allocation30_spill] sm:$0xff]  ;;  %v3205_v49 = vld [vmem:[#allocation29_spill] sm:$0xff]  ;;  %v1069_v27 = vshrl.u32 %v1068_v56, 7  ;;  %v2852_v32 = vld [vmem:[#allocation2] sm:$0x1] }
 0x1f9   : > { %v1036_v42 = vmax.f32 %v1032_v10, %v2161_v14  ;;  %v1037_v0 = vmax.f32 %v1033_v62, %v2157_v12 }
 0x1fa   : > { %v1038_v6 = vmax.f32 %v1034_v51, %v2169_v18  ;;  %v1039_v58 = vmax.f32 %v1035_v30, %v2165_v16  ;;  %v1070_v62 = vsub.s32 0, %v1069_v27 }
 0x1fb   : > { %v1040_v1 = vmax.f32 %v1036_v42, %v2177_v22  ;;  %v1041_v33 = vmax.f32 %v1037_v0, %v2173_v20 }
 0x1fc   : > { %v1042_v43 = vmax.f32 %v1038_v6, %v3196_v25  ;;  %v1043_v34 = vmax.f32 %v1039_v58, %v3197_v48 }
 0x1fd   : > { %v1044_v24 = vmax.f32 %v1040_v1, %v3198_v19  ;;  %v1045_v2 = vmax.f32 %v1041_v33, %v3199_v15 }
 0x1fe   : > { %v1046_v59 = vmax.f32 %v1042_v43, %v3200_v3  ;;  %v1047_v38 = vmax.f32 %v1043_v34, %v3201_v54 }
 0x1ff   : > { %v1048_v17 = vmax.f32 %v1044_v24, %v3202_v45  ;;  %v1049_v47 = vmax.f32 %v1045_v2, %v3203_v23 }
 0x200   : > { %v1050_v44 = vmax.f32 %v1046_v59, %v3204_v53  ;;  %v1051_v55 = vmax.f32 %v1047_v38, %v3205_v49 }
 0x201   : > { %v1052_v26 = vmax.f32 %v1048_v17, %v1049_v47 }
 0x202   : > { %v1053_v36 = vmax.f32 %v1050_v44, %v1051_v55 }
 0x204   : > { %v1054_v40 = vmax.f32 %v1052_v26, %v1053_v36 }
 0x206   : > { %v1055_v63 = vrot.slane %v1054_v40, 4 }
 0x208   : > { %v1056_v50 = vmax.f32 %v1054_v40, %v1055_v63 }
 0x20a   : > { %v1057_v28 = vrot.slane %v1056_v50, 2 }
 0x20c   : > { %v1058_v60 = vmax.f32 %v1056_v50, %v1057_v28 }
 0x20e   : > { %v1059_v61 = vrot.slane %v1058_v60, 1 }
 0x210   : > { %v1060_v31 = vmax.f32 %v1058_v60, %v1059_v61 }
 0x212   : > { %v2855_v10 = vmax.f32 %v2852_v32, %v1060_v31 }
 0x214   : > { %v1063_v51 = vsub.f32 %v2852_v32, %v2855_v10  ;;  %1208 = vst [vmem:[#allocation2] sm:$0x1] %v2855_v10  ;;  %v2861_v30 = vrot.slane %v2855_v10, %v1070_v62 }
 0x216   : > { %v1073_v42 = vsub.f32 %v3184_v46, %v2861_v30  ;;  %v1074_v0 = vsub.f32 %v3186_v7, %v2861_v30  ;;  %v1075_v6 = vsub.f32 %v3188_v37, %v2861_v30  ;;  %v1076_v58 = vsub.f32 %v3190_v11, %v2861_v30 }
 0x217   : > { %v1077_v1 = vsub.f32 %v3183_v5, %v2861_v30  ;;  %v1078_v34 = vsub.f32 %v3185_v4, %v2861_v30  ;;  %v1079_v46 = vsub.f32 %v3187_v13, %v2861_v30  ;;  %v1080_v37 = vsub.f32 %v3189_v8, %v2861_v30 }
 0x218   : > { %v1105_v33 = vmul.f32 1.442695, %v1073_v42  ;;  %v1107_v43 = vmul.f32 1.442695, %v1074_v0  ;;  %v1109_v24 = vmul.f32 1.442695, %v1075_v6  ;;  %v1081_v5 = vsub.f32 %v3191_v21, %v2861_v30 }
 0x219   : > { %v1111_v2 = vmul.f32 1.442695, %v1076_v58  ;;  %v1113_v7 = vmul.f32 1.442695, %v1077_v1  ;;  %v1115_v11 = vmul.f32 1.442695, %v1078_v34  ;;  %v1082_v4 = vsub.f32 %v3192_v9, %v2861_v30 }
 0x21a   : > { %1696 = vpow2.f32 %v1105_v33  ;;  %v1117_v59 = vmul.f32 1.442695, %v1079_v46  ;;  %v1119_v38 = vmul.f32 1.442695, %v1080_v37  ;;  %v1083_v13 = vsub.f32 %v3193_v57, %v2861_v30 }
 0x21b   : > { %1698 = vpow2.f32 %v1107_v43  ;;  %v1121_v17 = vmul.f32 1.442695, %v1081_v5  ;;  %v1084_v8 = vsub.f32 %v3194_v29, %v2861_v30  ;;  %v1123_v55 = vmul.f32 1.442695, %v1082_v4 }
 0x21c   : > { %1700 = vpow2.f32 %v1109_v24  ;;  %v1085_v9 = vsub.f32 %v3195_v52, %v2861_v30  ;;  %v1125_v40 = vmul.f32 1.442695, %v1083_v13  ;;  %v1086_v57 = vsub.f32 %v2203_v35, %v2861_v30 }
 0x21d   : > { %1702 = vpow2.f32 %v1111_v2  ;;  %v1127_v28 = vmul.f32 1.442695, %v1084_v8  ;;  %v1087_v29 = vsub.f32 %v2215_v41, %v2861_v30  ;;  %v1088_v52 = vsub.f32 %v2211_v39, %v2861_v30 }
 0x21e   : > { %1704 = vpow2.f32 %v1113_v7  ;;  %v1129_v61 = vmul.f32 1.442695, %v1085_v9  ;;  %v1131_v62 = vmul.f32 1.442695, %v1086_v57  ;;  %v1089_v35 = vsub.f32 %v2161_v14, %v2861_v30 }
 0x21f   : > { %1706 = vpow2.f32 %v1115_v11  ;;  %v1133_v6 = vmul.f32 1.442695, %v1087_v29  ;;  %v1090_v41 = vsub.f32 %v2157_v12, %v2861_v30  ;;  %v1135_v33 = vmul.f32 1.442695, %v1088_v52 }
 0x220   : > { %1708 = vpow2.f32 %v1117_v59  ;;  %v1091_v39 = vsub.f32 %v2169_v18, %v2861_v30  ;;  %v1137_v24 = vmul.f32 1.442695, %v1089_v35  ;;  %v1092_v14 = vsub.f32 %v2165_v16, %v2861_v30 }
 0x221   : > { %1710 = vpow2.f32 %v1119_v38  ;;  %v1139_v7 = vmul.f32 1.442695, %v1090_v41  ;;  %v1093_v12 = vsub.f32 %v2177_v22, %v2861_v30  ;;  %v1094_v18 = vsub.f32 %v2173_v20, %v2861_v30 }
 0x222   : > { %1712 = vpow2.f32 %v1121_v17  ;;  %v1141_v5 = vmul.f32 1.442695, %v1091_v39  ;;  %v1143_v38 = vmul.f32 1.442695, %v1092_v14  ;;  %v1095_v16 = vsub.f32 %v3196_v25, %v2861_v30 }
 0x223   : > { %1714 = vpow2.f32 %v1123_v55  ;;  %v1096_v22 = vsub.f32 %v3197_v48, %v2861_v30  ;;  %v1147_v55 = vmul.f32 1.442695, %v1094_v18  ;;  %v1097_v20 = vsub.f32 %v3198_v19, %v2861_v30 }
 0x224   : > { %v1697_v47 = vpop.eup %1696  ;;  %1716 = vpow2.f32 %v1125_v40  ;;  %v1098_v25 = vsub.f32 %v3199_v15, %v2861_v30  ;;  %v1099_v48 = vsub.f32 %v3200_v3, %v2861_v30  ;;  %v1100_v19 = vsub.f32 %v3201_v54, %v2861_v30 }
 0x225   : > { %v1699_v44 = vpop.eup %1698  ;;  %1718 = vpow2.f32 %v1127_v28  ;;  %v1153_v28 = vmul.f32 1.442695, %v1097_v20  ;;  %v1101_v15 = vsub.f32 %v3202_v45, %v2861_v30  ;;  %v1102_v3 = vsub.f32 %v3203_v23, %v2861_v30 }
 0x226   : > { %v1701_v21 = vpop.eup %1700  ;;  %v1169_v26 = vadd.f32 %v1699_v44, %v1697_v47  ;;  %1720 = vpow2.f32 %v1129_v61  ;;  %v1145_v47 = vmul.f32 1.442695, %v1093_v12  ;;  %v1155_v29 = vmul.f32 1.442695, %v1098_v25 }
 0x227   : > { %v1703_v36 = vpop.eup %1702  ;;  %1722 = vpow2.f32 %v1131_v62  ;;  %v1103_v54 = vsub.f32 %v3204_v53, %v2861_v30  ;;  %v1104_v45 = vsub.f32 %v3205_v49, %v2861_v30  ;;  %v1163_v41 = vmul.f32 1.442695, %v1102_v3 }
 0x228   : > { %v1170_v63 = vadd.f32 %v1701_v21, %v1169_v26  ;;  %v1705_v50 = vpop.eup %1704  ;;  %1724 = vpow2.f32 %v1133_v6  ;;  %v1161_v6 = vmul.f32 1.442695, %v1101_v15 }
 0x229   : > { %v1707_v60 = vpop.eup %1706  ;;  %1726 = vpow2.f32 %v1135_v33  ;;  %v1165_v23 = vmul.f32 1.442695, %v1103_v54 }
 0x22a   : > { %v1171_v56 = vadd.f32 %v1703_v36, %v1170_v63  ;;  %v1709_v31 = vpop.eup %1708  ;;  %1728 = vpow2.f32 %v1137_v24  ;;  %v1149_v36 = vmul.f32 1.442695, %v1095_v16  ;;  %v1151_v63 = vmul.f32 1.442695, %v1096_v22  ;;  %v1062_v22 = vld [vmem:[#allocation3] sm:$0x1] }
 0x22b   : > { %v1711_v0 = vpop.eup %1710  ;;  %1730 = vpow2.f32 %v1139_v7  ;;  %v1167_v24 = vmul.f32 1.442695, %v1104_v45 }
 0x22c   : > { %v1172_v27 = vadd.f32 %v1705_v50, %v1171_v56  ;;  %v1713_v1 = vpop.eup %1712  ;;  %1732 = vpow2.f32 %v1141_v5  ;;  %v1064_v5 = vmul.f32 1.442695, %v1063_v51 }
 0x22d   : > { %v1715_v34 = vpop.eup %1714  ;;  %1734 = vpow2.f32 %v1143_v38 }
 0x22e   : > { %v1173_v42 = vadd.f32 %v1707_v60, %v1172_v27  ;;  %v1717_v46 = vpop.eup %1716  ;;  %1736 = vpow2.f32 %v1145_v47 }
 0x22f   : > { %v1719_v11 = vpop.eup %1718  ;;  %1738 = vpow2.f32 %v1147_v55 }
 0x230   : > { %v1174_v58 = vadd.f32 %v1709_v31, %v1173_v42  ;;  %v1721_v4 = vpop.eup %1720  ;;  %1740 = vpow2.f32 %v1149_v36  ;;  %v1157_v31 = vmul.f32 1.442695, %v1099_v48  ;;  %v1159_v42 = vmul.f32 1.442695, %v1100_v19 }
 0x231   : > { %v1723_v17 = vpop.eup %1722  ;;  %1742 = vpow2.f32 %v1151_v63 }
 0x232   : > { %v1175_v43 = vadd.f32 %v1711_v0, %v1174_v58  ;;  %v1725_v8 = vpop.eup %1724  ;;  %1744 = vpow2.f32 %v1153_v28 }
 0x233   : > { %v1727_v26 = vpop.eup %1726  ;;  %1746 = vpow2.f32 %v1155_v29 }
 0x234   : > { %v1176_v2 = vadd.f32 %v1713_v1, %v1175_v43  ;;  %v1729_v40 = vpop.eup %1728  ;;  %1748 = vpow2.f32 %v1157_v31 }
 0x235   : > { %v1731_v57 = vpop.eup %1730  ;;  %1750 = vpow2.f32 %v1159_v42 }
 0x236   : > { %v1177_v37 = vadd.f32 %v1715_v34, %v1176_v2  ;;  %v1733_v60 = vpop.eup %1732  ;;  %1752 = vpow2.f32 %v1161_v6 }
 0x237   : > { %v1735_v27 = vpop.eup %1734  ;;  %1754 = vpow2.f32 %v1163_v41 }
 0x238   : > { %v1178_v59 = vadd.f32 %v1717_v46, %v1177_v37  ;;  %v1737_v62 = vpop.eup %1736  ;;  %1756 = vpow2.f32 %v1165_v23 }
 0x239   : > { %v1739_v35 = vpop.eup %1738  ;;  %1758 = vpow2.f32 %v1167_v24 }
 0x23a   : > { %v1179_v13 = vadd.f32 %v1719_v11, %v1178_v59  ;;  %v1741_v1 = vpop.eup %1740  ;;  %1760 = vpow2.f32 %v1064_v5 }
 0x23b   : > { %v1743_v43 = vpop.eup %1742 }
 0x23c   : > { %v1180_v44 = vadd.f32 %v1721_v4, %v1179_v13  ;;  %v1745_v39 = vpop.eup %1744 }
 0x23d   : > { %v1747_v46 = vpop.eup %1746 }
 0x23e   : > { %v1181_v21 = vadd.f32 %v1723_v17, %v1180_v44  ;;  %v1749_v14 = vpop.eup %1748 }
 0x23f   : > { %v1751_v37 = vpop.eup %1750 }
 0x240   : > { %v1182_v9 = vadd.f32 %v1725_v8, %v1181_v21  ;;  %v1753_v49 = vpop.eup %1752 }
 0x241   : > { %v1755_v12 = vpop.eup %1754 }
 0x242   : > { %v1183_v50 = vadd.f32 %v1727_v26, %v1182_v9  ;;  %v1757_v4 = vpop.eup %1756 }
 0x243   : > { %v1759_v38 = vpop.eup %1758 }
 0x244   : > { %v1184_v56 = vadd.f32 %v1729_v40, %v1183_v50  ;;  %v1761_v8 = vpop.eup %1760 }
 0x245   : > { %v1066_v21 = vmul.f32 %v1761_v8, %v1062_v22 }
 0x246   : > { %v1185_v61 = vadd.f32 %v1731_v57, %v1184_v56 }
 0x248   : > { %v1186_v52 = vadd.f32 %v1733_v60, %v1185_v61 }
 0x24a   : > { %v1187_v0 = vadd.f32 %v1735_v27, %v1186_v52 }
 0x24c   : > { %v1188_v58 = vadd.f32 %v1737_v62, %v1187_v0 }
 0x24e   : > { %v1189_v33 = vadd.f32 %v1739_v35, %v1188_v58 }
 0x250   : > { %v1190_v34 = vadd.f32 %v1741_v1, %v1189_v33 }
 0x252   : > { %v1191_v2 = vadd.f32 %v1743_v43, %v1190_v34 }
 0x254   : > { %v1192_v53 = vadd.f32 %v1745_v39, %v1191_v2 }
 0x256   : > { %v1193_v7 = vadd.f32 %v1747_v46, %v1192_v53 }
 0x258   : > { %v1194_v11 = vadd.f32 %v1749_v14, %v1193_v7 }
 0x25a   : > { %v1195_v30 = vadd.f32 %v1751_v37, %v1194_v11 }
 0x25c   : > { %v1196_v59 = vadd.f32 %v1753_v49, %v1195_v30 }
 0x25e   : > { %v1197_v18 = vadd.f32 %v1755_v12, %v1196_v59 }
 0x260   : > { %v1198_v13 = vadd.f32 %v1757_v4, %v1197_v18 }
 0x262   : > { %v1199_v17 = vadd.f32 %v1759_v38, %v1198_v13 }
 0x264   : > { %v1200_v16 = vrot.slane %v1199_v17, 4 }
 0x266   : > { %v1201_v47 = vadd.f32 %v1200_v16, %v1199_v17 }
 0x268   : > { %v1202_v44 = vrot.slane %v1201_v47, 2 }
 0x26a   : > { %v1203_v55 = vadd.f32 %v1202_v44, %v1201_v47 }
 0x26c   : > { %v1204_v26 = vrot.slane %v1203_v55, 1 }
 0x26e   : > { %v1205_v20 = vadd.f32 %v1204_v26, %v1203_v55 }
 0x270   : > { %v1206_v36 = vadd.f32 %v1205_v20, %v1066_v21 }
 0x272   : > { %1207 = vst [vmem:[#allocation3] sm:$0x1] %v1206_v36 }
 0x273 PF: > { %v1212_v32 = vld [vmem:[#allocation4] sm:$0x1]  ;;  %v1213_v10 = vld [vmem:[#allocation2] sm:$0x1]  ;;  %s1242_s5 = sshll.u32 %s2221_s12, 4  ;;  %s2935_s8 = scalar_lea.hbm %s2987_s2, %s1923_s24  ;;  %s2937_s5 = int_to_ptr.vmem [resolvable:$true] %s1242_s5 }
 0x274   : > { %v1214_v51 = vmax.f32 %v1213_v10, %v1212_v32  ;;  %s1230_s15 = scalar_lea.sflag [#allocation6], %s163_s23  ;;  %s1768_s16 = scalar_lea.vmem %s2937_s5, 16 }
 0x275   : > { %p1769_p1 = scmp.ne.s32.totalorder %s2937_s5, %s1768_s16  ;;  %s1850_s18 = smov [#allocation5]  }
 0x276   : > { %v1216_v9 = vsub.f32 %v1213_v10, %v1214_v51  ;;  %v1220_v40 = vsub.f32 %v1212_v32, %v1214_v51  ;;  %s1772_s20 = sshll.u32 %s1850_s18, 4  ;;  %s1773_s20 = int_to_ptr.vmem [resolvable:$false] %s1772_s20 }
 0x277   : > { %p1770_p2 = pnand %p1769_p1, %p1906_p4  ;;  %s1774_s25 = scalar_lea.vmem %s1773_s20, 32 }
 0x278   : > { %v1217_v25 = vmul.f32 1.442695, %v1216_v9  ;;  %v1221_v63 = vmul.f32 1.442695, %v1220_v40  ;;  %p1775_p5 = scmp.lt.s32.totalorder %s2937_s5, %s1773_s20  ;;  %p1776_p6 = scmp.lt.s32.totalorder %s1774_s25, %s1768_s16 }
 0x279   : > { %v1215_v50 = vld [vmem:[#allocation3] sm:$0x1]  ;;  %p1771_p3 = pneg %p1770_p2 }
 0x27a   : > { %1762 = vpow2.f32 %v1217_v25  ;;  %p1777_p7 = por %p1776_p6, %p1775_p5 }
 0x27b   : > { %1764 = vpow2.f32 %v1221_v63 }
 0x27c   : > { %p1778_p9 = pnand %p1777_p7, %p1771_p3 }
 0x284   : > { %v1763_v57 = vpop.eup %1762 }
 0x285   : > { %v1765_v48 = vpop.eup %1764  ;;  %v1219_v28 = vmul.f32 %v1763_v57, %v1215_v50 }
 0x287   : > { %v1223_v56 = vadd.f32 %v1765_v48, %v1219_v28 }
 0x289   : > { %1766 = vlog2.f32 %v1223_v56 }
 0x293   : > { %v1767_v60 = vpop.eup %1766 }
 0x294   : > { %v1225_v19 = vmul.f32 0.6931472, %v1767_v60 }
 0x296   : > { %v1226_v29 = vadd.f32 %v1225_v19, %v1214_v51 }
 0x298   : > { %v1227_v61 = vsub.f32 %v1226_v29, %v1212_v32 }
 0x29a   : > { %1228 = vst [vmem:[%s2221_s12] sm:$0x1] %v1227_v61 }
 0x29b   : > { %1781 = shalt.err (!%p1778_p9)
}
 0x29c   : > { %s1782_s23 = scalar_lea.hbm %s2935_s8, 16  ;;  %s1786_s27 = scalar_lea.hbm %s2987_s2, 32 }
 0x29d   : > { %p1783_p10 = scmp.ne.s32.totalorder %s2935_s8, %s1782_s23  ;;  %p1787_p13 = scmp.lt.u32.totalorder %s2935_s8, %s2987_s2 }
 0x29e   : > { %p1788_p0 = scmp.lt.u32.totalorder %s1786_s27, %s1782_s23  ;;  %p1790_p2 = scmp.lt.u32.totalorder %s1782_s23, %s2935_s8 }
 0x29f   : > { %p1784_p11 = pnand %p1783_p10, %p1906_p4 }
 0x2a0   : > { %p1789_p1 = por %p1788_p0, %p1787_p13 }
 0x2a1   : > { %p1785_p12 = pneg %p1784_p11 }
 0x2a2   : > { %p1791_p3 = por %p1790_p2, %p1789_p1 }
 0x2a4   : > { %p1792_p5 = pnand %p1791_p3, %p1785_p12 }
 0x2a6   : > { %1795 = shalt.err (!%p1792_p5)
}
 0x2a7   : > { %1573 = dma.vmem_to_hbm [thread:$0]  (%p1906_p4), %s2937_s5, 16, %s2935_s8, %s1230_s15  }
 0x2a8 PF: > { %p1579_p6 = scmp.ge.s32.totalorder %s1846_s14, 2  ;;  %s1254_s30 = sand.u32 1, %s1826_s9  }
 0x2a9   : > { %s1255_s3 = scalar_lea.sflag [#allocation6], %s1254_s30 }
 0x2aa   : > { %p1576_p7 = pnand %p1579_p6, %p1913_p8 }
 0x2ac   : > { %1821 = dma.done.wait (!%p1576_p7), %s1255_s3, 16  }
 0x2ad   : > { %1823 = vsyncadd (!%p1576_p7), %s1255_s3, 4294967280  ;;  %s15_s14 = sadd.s32 1, %s1846_s14   ;;  %s3206_s9 = smov %s1830_s10 }
 0x2ae   : > { %p12_p9 = scmp.ge.s32.totalorder %s15_s14, 4   ;;  %s3207_s10 = smov %s1834_s11 }
 0x2af   : > { %s3208_s11 = smov %s1919_s22  ;;  %s3209_s12 = smov %s1842_s13 }
 0x2b0   : > { %s3210_s13 = smov %s3212_s17  ;;  %14 = sbr.rel (!%p12_p9) target bundleno = 4 (0x4), region = 82 }
 0x2b7   :  { %1259 = vsyncpa [#allocation6], 1 }
 0x2b8   :  { %1261 = vsyncpa [#allocation6 + $0x1], 1 }

</bundles_post_ra>
